<compile_context>
chip_gen: v6e
topology: v6e:2x2x1
jax: 0.10.0
libtpu: 0.0.40
codegen_flags: <defaults>
</compile_context>

<pallas_src>
import functools

import jax
import jax.numpy as jnp
from jax.experimental import pallas as pl
from jax.experimental.pallas import tpu as pltpu


def _round_up(x, m):
    return (x + m - 1) // m * m


def _conloss_kernel(cid_row_ref, cid_col_ref, protos_ref, contrast_ref,   # inputs
                    out_ref,                                              # output
                    anchor_ref, m_ref, l_ref, s_ref, p_ref,               # scratch
                    *, temperature, base_temperature, n_valid, c_pad, tq, tk):
    i = pl.program_id(0)      # anchor-row block (parallel)
    k = pl.program_id(1)      # contrast-column block (arbitrary, innermost)

    # ---------------- per-row-block init (first column block only) -----------
    @pl.when(k == 0)
    def _init():
        # anchor tile = global_protos[class_id[row]] via one-hot gather on MXU,
        # pre-scaled by 1/T so the inner loop's logits come out already scaled.
        cid_r = cid_row_ref[...]                                      # (tq, 1) int32
        cls_iota = jax.lax.broadcasted_iota(jnp.int32, (tq, c_pad), 1)
        onehot = (cid_r == cls_iota).astype(protos_ref.dtype)         # (tq, c_pad)
        anchor = jnp.dot(onehot, protos_ref[...],
                         preferred_element_type=jnp.float32)
        anchor = anchor * jnp.float32(1.0 / temperature)
        anchor_ref[...] = anchor.astype(anchor_ref.dtype)
        m_ref[...] = jnp.full((tq, 1), -jnp.inf, jnp.float32)
        l_ref[...] = jnp.zeros((tq, 1), jnp.float32)
        s_ref[...] = jnp.zeros((tq, 1), jnp.float32)
        p_ref[...] = jnp.zeros((tq, 1), jnp.float32)

    # ---------------- logits tile: (anchor/T) @ contrast_tile.T ---------------
    adc = jax.lax.dot_general(anchor_ref[...], contrast_ref[...],
                              (((1,), (1,)), ((), ())),
                              preferred_element_type=jnp.float32)     # (tq, tk)

    row_g = i * tq + jax.lax.broadcasted_iota(jnp.int32, (tq, tk), 0)
    col_g = k * tk + jax.lax.broadcasted_iota(jnp.int32, (tq, tk), 1)
    col_valid = col_g < n_valid                # drop zero-padded contrast columns
    not_diag = row_g != col_g                  # self-contrast exclusion
    keep = jnp.logical_and(col_valid, not_diag)

    # positives mask: same class, not self, valid column (VPU compare only)
    pos = jnp.logical_and(cid_row_ref[...] == cid_col_ref[...], keep)
    pos_f = pos.astype(jnp.float32)

    # ---------------- online (flash-style) accumulation -----------------------
    neg_inf = jnp.float32(-jnp.inf)
    # row max over *valid* columns (diagonal included), exactly like the
    # reference's logits_max (which is taken before logits_mask is applied).
    tile_max = jnp.max(jnp.where(col_valid, adc, neg_inf), axis=1, keepdims=True)
    m_new = jnp.maximum(m_ref[...], tile_max)
    alpha = jnp.exp(m_ref[...] - m_new)
    e = jnp.exp(adc - m_new) * keep.astype(jnp.float32)              # masked -> 0
    l_ref[...] = alpha * l_ref[...] + jnp.sum(e, axis=1, keepdims=True)
    s_ref[...] = s_ref[...] + jnp.sum(pos_f * adc, axis=1, keepdims=True)
    p_ref[...] = p_ref[...] + jnp.sum(pos_f, axis=1, keepdims=True)
    m_ref[...] = m_new

    # ---------------- finalize on the last column block -----------------------
    @pl.when(k == pl.num_programs(1) - 1)
    def _finalize():
        # sum_j mask*log_prob = s - p*m - p*log(l)   =>   mean = s/p - m - log(l)
        mean_log_prob_pos = s_ref[...] / p_ref[...] - m_ref[...] - jnp.log(l_ref[...])
        scale = jnp.float32(-(temperature / base_temperature))
        out_ref[...] = scale * mean_log_prob_pos                      # (tq, 1)


def con_loss(features, labels, global_protos, temperature=0.07,
             base_temperature=0.07, tile=256, compute_dtype=jnp.float32):
    """ConLoss forward, contrast_mode='all'. Returns a scalar.

    Matches the PyTorch reference for one-hot `labels` (the reference's
    anchor-overwrite loop already assumes one-hot). Rows/columns are processed
    in sample-major order — a consistent relabeling the loss is invariant to —
    so the contrast matrix is features.reshape(N, D) with no transposed copy.
    """
    if features.ndim < 3:
        raise ValueError("`features` needs to be [bsz, n_views, ...]")
    if labels.shape[0] != features.shape[0]:
        raise ValueError("Num of labels does not match num of features")
    # TODO(synk): contrast_mode='one' is not implemented (default 'all' only).

    bsz, n_views = features.shape[0], features.shape[1]
    feats = features.reshape(bsz, n_views, -1)
    d = feats.shape[-1]
    n = bsz * n_views
    c = global_protos.shape[0]
    cdt = jnp.dtype(compute_dtype)

    # class id per (sample, view) anchor/contrast row, sample-major order
    cids = jnp.argmax(labels, axis=1).astype(jnp.int32)               # [B]
    cid_rows = jnp.repeat(cids, n_views)                              # [N]

    tq = tk = min(int(tile), _round_up(n, 128))
    n_pad = _round_up(n, tq)
    d_pad = _round_up(d, 128)
    c_pad = _round_up(c, 128)

    contrast = feats.reshape(n, d).astype(cdt)                        # no transpose
    contrast = jnp.pad(contrast, ((0, n_pad - n), (0, d_pad - d)))
    protos = jnp.pad(global_protos.astype(cdt),
                     ((0, c_pad - c), (0, d_pad - d)))
    cid_pad = jnp.pad(cid_rows, (0, n_pad - n), constant_values=-1)
    cid_row = cid_pad.reshape(n_pad, 1)
    cid_col = cid_pad.reshape(1, n_pad)

    grid = (n_pad // tq, n_pad // tk)
    kernel = functools.partial(
        _conloss_kernel,
        temperature=float(temperature),
        base_temperature=float(base_temperature),
        n_valid=n, c_pad=c_pad, tq=tq, tk=tk)

    itemsize = contrast.dtype.itemsize
    flops = 2 * n_pad * n_pad * d_pad + 2 * n_pad * c_pad * d_pad
    transcendentals = n_pad * n_pad + 4 * n_pad
    bytes_accessed = ((n_pad // tq) * n_pad * d_pad * itemsize        # contrast re-reads
                      + c_pad * d_pad * itemsize + 2 * n_pad * 4 + n_pad * 4)

    out = pl.pallas_call(
        kernel,
        out_shape=jax.ShapeDtypeStruct((n_pad, 1), jnp.float32),
        grid_spec=pltpu.PrefetchScalarGridSpec(
            num_scalar_prefetch=0,
            grid=grid,
            in_specs=[
                pl.BlockSpec((tq, 1), lambda i, k: (i, 0)),           # row class ids
                pl.BlockSpec((1, tk), lambda i, k: (0, k)),           # col class ids
                pl.BlockSpec((c_pad, d_pad), lambda i, k: (0, 0)),    # prototypes (resident)
                pl.BlockSpec((tk, d_pad), lambda i, k: (k, 0)),       # contrast column tile
            ],
            out_specs=pl.BlockSpec((tq, 1), lambda i, k: (i, 0)),     # per-row loss, resident over k
            scratch_shapes=[
                pltpu.VMEM((tq, d_pad), cdt),                         # anchor/T tile
                pltpu.VMEM((tq, 1), jnp.float32),                     # running max m
                pltpu.VMEM((tq, 1), jnp.float32),                     # running denom l
                pltpu.VMEM((tq, 1), jnp.float32),                     # sum(mask * logits) s
                pltpu.VMEM((tq, 1), jnp.float32),                     # positive count p
            ]),
        compiler_params=pltpu.CompilerParams(
            dimension_semantics=("parallel", "arbitrary"),
            vmem_limit_bytes=32 * 1024 * 1024),
        cost_estimate=pl.CostEstimate(flops=flops,
                                      transcendentals=transcendentals,
                                      bytes_accessed=bytes_accessed),
    )(cid_row, cid_col, protos, contrast)

    return jnp.mean(out[:n, 0])     # drop padded rows, reduce to scalar


def con_loss_ref(features, labels, global_protos, temperature=0.07,
                 base_temperature=0.07):
    """Pure-JAX mirror of the PyTorch forward (contrast_mode='all', view-major)."""
    bsz, n_views = features.shape[0], features.shape[1]
    feats = features.reshape(bsz, n_views, -1).astype(jnp.float32)
    d = feats.shape[-1]
    contrast = jnp.transpose(feats, (1, 0, 2)).reshape(n_views * bsz, d)
    anchor_count = n_views
    labels_f = labels.astype(jnp.float32)
    class_idx = jnp.argmax(labels_f, axis=1)
    anchor = jnp.tile(global_protos.astype(jnp.float32)[class_idx], (anchor_count, 1))
    adc = (anchor @ contrast.T) / temperature
    logits = adc - jnp.max(adc, axis=1, keepdims=True)
    mask = jnp.tile(labels_f @ labels_f.T, (anchor_count, n_views))
    n = anchor_count * bsz
    logits_mask = 1.0 - jnp.eye(n, dtype=jnp.float32)
    mask = mask * logits_mask
    exp_logits = jnp.exp(logits) * logits_mask
    log_prob = logits - jnp.log(jnp.sum(exp_logits, axis=1, keepdims=True))
    mlpp = jnp.sum(mask * log_prob, axis=1) / jnp.sum(mask, axis=1)
    loss = -(temperature / base_temperature) * mlpp
    return jnp.mean(loss)


if __name__ == "__main__":
    key = jax.random.PRNGKey(0)
    keys = jax.random.split(key, 6)

    def run_case(B, V, D, C, tile, k1, k2, k3):
        features = jax.random.normal(k1, (B, V, D), dtype=jnp.float32)
        class_ids = jax.random.randint(k2, (B,), 0, C)
        labels = jax.nn.one_hot(class_ids, C, dtype=jnp.float32)
        protos = jax.random.normal(k3, (C, D), dtype=jnp.float32)

        loss = jax.block_until_ready(con_loss(features, labels, protos, tile=tile))
        ref = con_loss_ref(features, labels, protos)
        assert jnp.isfinite(loss), "loss is not finite"
        assert jnp.allclose(loss, ref, rtol=1e-2, atol=1e-2), (loss, ref)

    # small single-block case (B=8, V=2, D=32, C=4)
    run_case(8, 2, 32, 4, 256, keys[0], keys[1], keys[2])
    # multi-block case: exercises online-softmax accumulation across column
    # blocks and row/column padding (N=144 -> 2x2 grid with tile=128)
    run_case(72, 2, 48, 6, 128, keys[3], keys[4], keys[5])

    print("KERNEL_OK")
</pallas_src>

<mosaic_0001>
module attributes {stable_mosaic.version = 11 : i64} {
  func.func @_conloss_kernel(%arg0: i32, %arg1: i32, %arg2: memref<128x1xi32, #tpu.memory_space<vmem>>, %arg3: memref<1x128xi32, #tpu.memory_space<vmem>>, %arg4: memref<128x128xf32, #tpu.memory_space<vmem>>, %arg5: memref<128x128xf32, #tpu.memory_space<vmem>>, %arg6: memref<128x1xf32, #tpu.memory_space<vmem>>, %arg7: memref<128x128xf32, #tpu.memory_space<vmem>>, %arg8: memref<128x1xf32, #tpu.memory_space<vmem>>, %arg9: memref<128x1xf32, #tpu.memory_space<vmem>>, %arg10: memref<128x1xf32, #tpu.memory_space<vmem>>, %arg11: memref<128x1xf32, #tpu.memory_space<vmem>>) attributes {dimension_semantics = [#tpu.dimension_semantics<parallel>, #tpu.dimension_semantics<arbitrary>], iteration_bounds = array<i64: 1, 1>, scalar_prefetch = 0 : i64, scratch_operands = 5 : i64, tpu.core_type = #tpu.core_type<tc>, window_params = [{transform_indices = @transform_0, window_bounds = array<i64: 128, 1>}, {transform_indices = @transform_1, window_bounds = array<i64: 1, 128>}, {pipeline_mode = #tpu.pipeline_mode<synchronous>, transform_indices = @transform_2, window_bounds = array<i64: 128, 128>}, {transform_indices = @transform_3, window_bounds = array<i64: 128, 128>}, {transform_indices = @transform_4, window_bounds = array<i64: 128, 1>}]} {
    %c0_i32 = arith.constant 0 : i32
    %0 = arith.cmpi eq, %arg1, %c0_i32 : i32
    %1 = arith.extui %0 : i1 to i32
    %c0_i32_0 = arith.constant 0 : i32
    %2 = arith.cmpi ne, %1, %c0_i32_0 : i32
    scf.if %2 {
      %c0_34 = arith.constant 0 : index
      %c0_35 = arith.constant 0 : index
      %62 = vector.load %arg2[%c0_34, %c0_35] : memref<128x1xi32, #tpu.memory_space<vmem>>, vector<128x1xi32>
      %63 = tpu.iota {dimensions = array<i32: 1>} : vector<128x128xi32>
      %64 = vector.broadcast %62 : vector<128x1xi32> to vector<128x128xi32>
      %65 = arith.cmpi eq, %64, %63 : vector<128x128xi32>
      %66 = arith.extui %65 : vector<128x128xi1> to vector<128x128xi32>
      %67 = arith.sitofp %66 : vector<128x128xi32> to vector<128x128xf32>
      %c0_36 = arith.constant 0 : index
      %c0_37 = arith.constant 0 : index
      %68 = vector.load %arg4[%c0_36, %c0_37] : memref<128x128xf32, #tpu.memory_space<vmem>>, vector<128x128xf32>
      %cst_38 = arith.constant dense<0.000000e+00> : vector<128x128xf32>
      %69 = tpu.matmul %67, %68, %cst_38 {dimension_numbers = #tpu.dot_dimension_numbers<[1], [0], [0], [1], [0, 0, 1, 1], [], []>} : vector<128x128xf32>, vector<128x128xf32>, vector<128x128xf32> -> vector<128x128xf32>
      %cst_39 = arith.constant 14.2857141 : f32
      %70 = vector.broadcast %cst_39 : f32 to vector<128x128xf32>
      %71 = arith.mulf %69, %70 : vector<128x128xf32>
      %c0_40 = arith.constant 0 : index
      %c0_41 = arith.constant 0 : index
      %72 = vector.load %arg7[%c0_40, %c0_41] : memref<128x128xf32, #tpu.memory_space<vmem>>, vector<128x128xf32>
      tpu.vector_store %arg7[%c0_40, %c0_41], %71 {strides = array<i32>} : memref<128x128xf32, #tpu.memory_space<vmem>>, vector<128x128xf32>,
      %cst_42 = arith.constant 0xFF800000 : f32
      %73 = vector.broadcast %cst_42 : f32 to vector<128x1xf32>
      %c0_43 = arith.constant 0 : index
      %c0_44 = arith.constant 0 : index
      %74 = vector.load %arg8[%c0_43, %c0_44] : memref<128x1xf32, #tpu.memory_space<vmem>>, vector<128x1xf32>
      tpu.vector_store %arg8[%c0_43, %c0_44], %73 {strides = array<i32>} : memref<128x1xf32, #tpu.memory_space<vmem>>, vector<128x1xf32>,
      %cst_45 = arith.constant 0.000000e+00 : f32
      %75 = vector.broadcast %cst_45 : f32 to vector<128x1xf32>
      %c0_46 = arith.constant 0 : index
      %c0_47 = arith.constant 0 : index
      %76 = vector.load %arg9[%c0_46, %c0_47] : memref<128x1xf32, #tpu.memory_space<vmem>>, vector<128x1xf32>
      tpu.vector_store %arg9[%c0_46, %c0_47], %75 {strides = array<i32>} : memref<128x1xf32, #tpu.memory_space<vmem>>, vector<128x1xf32>,
      %cst_48 = arith.constant 0.000000e+00 : f32
      %77 = vector.broadcast %cst_48 : f32 to vector<128x1xf32>
      %c0_49 = arith.constant 0 : index
      %c0_50 = arith.constant 0 : index
      %78 = vector.load %arg10[%c0_49, %c0_50] : memref<128x1xf32, #tpu.memory_space<vmem>>, vector<128x1xf32>
      tpu.vector_store %arg10[%c0_49, %c0_50], %77 {strides = array<i32>} : memref<128x1xf32, #tpu.memory_space<vmem>>, vector<128x1xf32>,
      %cst_51 = arith.constant 0.000000e+00 : f32
      %79 = vector.broadcast %cst_51 : f32 to vector<128x1xf32>
      %c0_52 = arith.constant 0 : index
      %c0_53 = arith.constant 0 : index
      %80 = vector.load %arg11[%c0_52, %c0_53] : memref<128x1xf32, #tpu.memory_space<vmem>>, vector<128x1xf32>
      tpu.vector_store %arg11[%c0_52, %c0_53], %79 {strides = array<i32>} : memref<128x1xf32, #tpu.memory_space<vmem>>, vector<128x1xf32>,
    } else {
    }
    %c0 = arith.constant 0 : index
    %c0_1 = arith.constant 0 : index
    %3 = vector.load %arg7[%c0, %c0_1] : memref<128x128xf32, #tpu.memory_space<vmem>>, vector<128x128xf32>
    %c0_2 = arith.constant 0 : index
    %c0_3 = arith.constant 0 : index
    %4 = vector.load %arg5[%c0_2, %c0_3] : memref<128x128xf32, #tpu.memory_space<vmem>>, vector<128x128xf32>
    %cst = arith.constant dense<0.000000e+00> : vector<128x128xf32>
    %5 = tpu.matmul %3, %4, %cst {dimension_numbers = #tpu.dot_dimension_numbers<[1], [1], [0], [0], [0, 0, 1, 0], [], []>} : vector<128x128xf32>, vector<128x128xf32>, vector<128x128xf32> -> vector<128x128xf32>
    %c128_i32 = arith.constant 128 : i32
    %6 = arith.muli %arg0, %c128_i32 : i32
    %7 = tpu.iota {dimensions = array<i32: 0>} : vector<128x128xi32>
    %8 = vector.broadcast %6 : i32 to vector<128x128xi32>
    %9 = arith.addi %8, %7 : vector<128x128xi32>
    %c128_i32_4 = arith.constant 128 : i32
    %10 = arith.muli %arg1, %c128_i32_4 : i32
    %11 = tpu.iota {dimensions = array<i32: 1>} : vector<128x128xi32>
    %12 = vector.broadcast %10 : i32 to vector<128x128xi32>
    %13 = arith.addi %12, %11 : vector<128x128xi32>
    %c16_i32 = arith.constant 16 : i32
    %14 = vector.broadcast %c16_i32 : i32 to vector<128x128xi32>
    %15 = arith.cmpi slt, %13, %14 : vector<128x128xi32>
    %16 = arith.cmpi ne, %9, %13 : vector<128x128xi32>
    %17 = arith.andi %15, %16 : vector<128x128xi1>
    %c0_5 = arith.constant 0 : index
    %c0_6 = arith.constant 0 : index
    %18 = vector.load %arg2[%c0_5, %c0_6] : memref<128x1xi32, #tpu.memory_space<vmem>>, vector<128x1xi32>
    %c0_7 = arith.constant 0 : index
    %c0_8 = arith.constant 0 : index
    %19 = vector.load %arg3[%c0_7, %c0_8] : memref<1x128xi32, #tpu.memory_space<vmem>>, vector<1x128xi32>
    %20 = vector.broadcast %18 : vector<128x1xi32> to vector<128x128xi32>
    %21 = vector.broadcast %19 : vector<1x128xi32> to vector<128x128xi32>
    %22 = arith.cmpi eq, %20, %21 : vector<128x128xi32>
    %23 = arith.andi %22, %17 : vector<128x128xi1>
    %24 = arith.extui %23 : vector<128x128xi1> to vector<128x128xi32>
    %25 = arith.sitofp %24 : vector<128x128xi32> to vector<128x128xf32>
    %cst_9 = arith.constant 0xFF800000 : f32
    %26 = vector.broadcast %cst_9 : f32 to vector<128x128xf32>
    %27 = arith.select %15, %5, %26 : vector<128x128xi1>, vector<128x128xf32>
    %cst_10 = arith.constant dense<0xFF800000> : vector<128xf32>
    %28 = vector.multi_reduction <maximumf>, %27, %cst_10 [1] : vector<128x128xf32> to vector<128xf32>
    %29 = vector.shape_cast %28 : vector<128xf32> to vector<128x1xf32>
    %c0_11 = arith.constant 0 : index
    %c0_12 = arith.constant 0 : index
    %30 = vector.load %arg8[%c0_11, %c0_12] : memref<128x1xf32, #tpu.memory_space<vmem>>, vector<128x1xf32>
    %31 = arith.maximumf %30, %29 : vector<128x1xf32>
    %c0_13 = arith.constant 0 : index
    %c0_14 = arith.constant 0 : index
    %32 = vector.load %arg8[%c0_13, %c0_14] : memref<128x1xf32, #tpu.memory_space<vmem>>, vector<128x1xf32>
    %33 = arith.subf %32, %31 : vector<128x1xf32>
    %34 = math.exp %33 : vector<128x1xf32>
    %35 = vector.broadcast %31 : vector<128x1xf32> to vector<128x128xf32>
    %36 = arith.subf %5, %35 : vector<128x128xf32>
    %37 = math.exp %36 : vector<128x128xf32>
    %38 = arith.extui %17 : vector<128x128xi1> to vector<128x128xi32>
    %39 = arith.sitofp %38 : vector<128x128xi32> to vector<128x128xf32>
    %40 = arith.mulf %37, %39 : vector<128x128xf32>
    %c0_15 = arith.constant 0 : index
    %c0_16 = arith.constant 0 : index
    %41 = vector.load %arg9[%c0_15, %c0_16] : memref<128x1xf32, #tpu.memory_space<vmem>>, vector<128x1xf32>
    %42 = arith.mulf %34, %41 : vector<128x1xf32>
    %cst_17 = arith.constant dense<0.000000e+00> : vector<128xf32>
    %43 = vector.multi_reduction <add>, %40, %cst_17 [1] : vector<128x128xf32> to vector<128xf32>
    %44 = vector.shape_cast %43 : vector<128xf32> to vector<128x1xf32>
    %45 = arith.addf %42, %44 : vector<128x1xf32>
    %c0_18 = arith.constant 0 : index
    %c0_19 = arith.constant 0 : index
    %46 = vector.load %arg9[%c0_18, %c0_19] : memref<128x1xf32, #tpu.memory_space<vmem>>, vector<128x1xf32>
    tpu.vector_store %arg9[%c0_18, %c0_19], %45 {strides = array<i32>} : memref<128x1xf32, #tpu.memory_space<vmem>>, vector<128x1xf32>,
    %c0_20 = arith.constant 0 : index
    %c0_21 = arith.constant 0 : index
    %47 = vector.load %arg10[%c0_20, %c0_21] : memref<128x1xf32, #tpu.memory_space<vmem>>, vector<128x1xf32>
    %48 = arith.mulf %25, %5 : vector<128x128xf32>
    %cst_22 = arith.constant dense<0.000000e+00> : vector<128xf32>
    %49 = vector.multi_reduction <add>, %48, %cst_22 [1] : vector<128x128xf32> to vector<128xf32>
    %50 = vector.shape_cast %49 : vector<128xf32> to vector<128x1xf32>
    %51 = arith.addf %47, %50 : vector<128x1xf32>
    %c0_23 = arith.constant 0 : index
    %c0_24 = arith.constant 0 : index
    %52 = vector.load %arg10[%c0_23, %c0_24] : memref<128x1xf32, #tpu.memory_space<vmem>>, vector<128x1xf32>
    tpu.vector_store %arg10[%c0_23, %c0_24], %51 {strides = array<i32>} : memref<128x1xf32, #tpu.memory_space<vmem>>, vector<128x1xf32>,
    %c0_25 = arith.constant 0 : index
    %c0_26 = arith.constant 0 : index
    %53 = vector.load %arg11[%c0_25, %c0_26] : memref<128x1xf32, #tpu.memory_space<vmem>>, vector<128x1xf32>
    %cst_27 = arith.constant dense<0.000000e+00> : vector<128xf32>
    %54 = vector.multi_reduction <add>, %25, %cst_27 [1] : vector<128x128xf32> to vector<128xf32>
    %55 = vector.shape_cast %54 : vector<128xf32> to vector<128x1xf32>
    %56 = arith.addf %53, %55 : vector<128x1xf32>
    %c0_28 = arith.constant 0 : index
    %c0_29 = arith.constant 0 : index
    %57 = vector.load %arg11[%c0_28, %c0_29] : memref<128x1xf32, #tpu.memory_space<vmem>>, vector<128x1xf32>
    tpu.vector_store %arg11[%c0_28, %c0_29], %56 {strides = array<i32>} : memref<128x1xf32, #tpu.memory_space<vmem>>, vector<128x1xf32>,
    %c0_30 = arith.constant 0 : index
    %c0_31 = arith.constant 0 : index
    %58 = vector.load %arg8[%c0_30, %c0_31] : memref<128x1xf32, #tpu.memory_space<vmem>>, vector<128x1xf32>
    tpu.vector_store %arg8[%c0_30, %c0_31], %31 {strides = array<i32>} : memref<128x1xf32, #tpu.memory_space<vmem>>, vector<128x1xf32>,
    %c0_i32_32 = arith.constant 0 : i32
    %59 = arith.cmpi eq, %arg1, %c0_i32_32 : i32
    %60 = arith.extui %59 : i1 to i32
    %c0_i32_33 = arith.constant 0 : i32
    %61 = arith.cmpi ne, %60, %c0_i32_33 : i32
    scf.if %61 {
      %c0_34 = arith.constant 0 : index
      %c0_35 = arith.constant 0 : index
      %62 = vector.load %arg10[%c0_34, %c0_35] : memref<128x1xf32, #tpu.memory_space<vmem>>, vector<128x1xf32>
      %c0_36 = arith.constant 0 : index
      %c0_37 = arith.constant 0 : index
      %63 = vector.load %arg11[%c0_36, %c0_37] : memref<128x1xf32, #tpu.memory_space<vmem>>, vector<128x1xf32>
      %64 = arith.divf %62, %63 : vector<128x1xf32>
      %c0_38 = arith.constant 0 : index
      %c0_39 = arith.constant 0 : index
      %65 = vector.load %arg8[%c0_38, %c0_39] : memref<128x1xf32, #tpu.memory_space<vmem>>, vector<128x1xf32>
      %66 = arith.subf %64, %65 : vector<128x1xf32>
      %c0_40 = arith.constant 0 : index
      %c0_41 = arith.constant 0 : index
      %67 = vector.load %arg9[%c0_40, %c0_41] : memref<128x1xf32, #tpu.memory_space<vmem>>, vector<128x1xf32>
      %68 = math.log %67 : vector<128x1xf32>
      %69 = arith.subf %66, %68 : vector<128x1xf32>
      %cst_42 = arith.constant -1.000000e+00 : f32
      %70 = vector.broadcast %cst_42 : f32 to vector<128x1xf32>
      %71 = arith.mulf %70, %69 : vector<128x1xf32>
      %c0_43 = arith.constant 0 : index
      %c0_44 = arith.constant 0 : index
      %72 = vector.load %arg6[%c0_43, %c0_44] : memref<128x1xf32, #tpu.memory_space<vmem>>, vector<128x1xf32>
      tpu.vector_store %arg6[%c0_43, %c0_44], %71 {strides = array<i32>} : memref<128x1xf32, #tpu.memory_space<vmem>>, vector<128x1xf32>,
    } else {
    }
    return
  }
  func.func @transform_0(%arg0: i32, %arg1: i32) -> (i32, i32) {
    %c0_i32 = arith.constant 0 : i32
    %c0_i32_0 = arith.constant 0 : i32
    return %arg0, %c0_i32 : i32, i32
  }
  func.func @transform_1(%arg0: i32, %arg1: i32) -> (i32, i32) {
    %c0_i32 = arith.constant 0 : i32
    %c0_i32_0 = arith.constant 0 : i32
    return %c0_i32, %arg1 : i32, i32
  }
  func.func @transform_2(%arg0: i32, %arg1: i32) -> (i32, i32) {
    %c0_i32 = arith.constant 0 : i32
    %c0_i32_0 = arith.constant 0 : i32
    %c0_i32_1 = arith.constant 0 : i32
    return %c0_i32, %c0_i32_0 : i32, i32
  }
  func.func @transform_3(%arg0: i32, %arg1: i32) -> (i32, i32) {
    %c0_i32 = arith.constant 0 : i32
    %c0_i32_0 = arith.constant 0 : i32
    return %arg1, %c0_i32 : i32, i32
  }
  func.func @transform_4(%arg0: i32, %arg1: i32) -> (i32, i32) {
    %c0_i32 = arith.constant 0 : i32
    %c0_i32_0 = arith.constant 0 : i32
    return %arg0, %c0_i32 : i32, i32
  }
}

</mosaic_0001>

<bundles_post_ra>
// kernel: tpu_custom_call.1
= control target key start
LH: loop header
LB: loop body
LE: loop exit
PB: predicated region body
PF: predicated region fallthrough
CT: control target
= control target key end

     0   :  { %9 = vsyncpa [#allocation8], 0  ;;  %s1983_s15 = smov [#allocation7]   ;;  %s3051_s0 = inlined_call_operand.vmem [shape: s32[128,1], index: 0, kind: input, shape index: {}]   ;;  %s3052_s1 = inlined_call_operand.vmem [shape: s32[1,128], index: 1, kind: input, shape index: {}]   ;;  %s3053_s2 = inlined_call_operand.vmem [shape: f32[128,128], index: 2, kind: input, shape index: {}]   ;;  %s3054_s3 = inlined_call_operand.hbm [shape: f32[128,128], index: 3, kind: input, shape index: {}]   ;;  %s3055_s4 = inlined_call_operand.vmem [shape: f32[128,1], index: 4, kind: output, shape index: {}]  }
   0x1   :  { %s21_s16 = sshll.u32 %s1983_s15, 4  ;;  %s22_s16 = int_to_ptr.vmem [resolvable:$true] %s21_s16 }
   0x2   :  { %s1969_s17 = scalar_lea.vmem %s22_s16, 2048  ;;  %p1974_p1 = scmp.lt.s32.totalorder %s22_s16, %s22_s16 }
   0x3   :  { %p1970_p0 = scmp.ne.s32.totalorder %s22_s16, %s1969_s17  ;;  %p1975_p2 = scmp.lt.s32.totalorder %s1969_s17, %s1969_s17 }
   0x5   :  { %p1976_p3 = por %p1975_p2, %p1974_p1 }
   0x7   :  { %p1977_p4 = pnand %p1976_p3, %p1970_p0 }
   0x9   :  { %1980 = shalt.err (!%p1977_p4)
}
   0xa   :  { %s1984_s18 = smov 128   ;;  %s1985_s19 = smov 8  }
   0xb   :  { %27 = dma.hbm_to_vmem [thread:$0]  %s3054_s3, 2048, %s22_s16, [#allocation8], %s1984_s18, %s1984_s18, %s1985_s19  }
   0xc   :  { %1981 = dma.done.wait [#allocation8], 2048  }
   0xd   :  { %1982 = vsyncadd [#allocation8], 4294965248  ;;  %v1986_v0 = vmov 0   ;;  %v2021_v1 = vld [vmem:[%s3051_s0 + $0x10] sm:$0xff]  ;;  %v2026_v2 = vld [vmem:[%s3051_s0] sm:$0xff]  ;;  %vm3071_vm0 = vcmask 7168   ;;  %v51_v43 = vlaneseq }
   0xe   :  { %1832 = vset.pattern.permute.xlu1 %v1986_v0  ;;  %1831 = vset.pattern.permute.xlu0 %v1986_v0  ;;  %v2033_v3 = vld [vmem:[%s3051_s0 + $0x18] sm:$0xff]  ;;  %v36_v4 = vld [vmem:[%s3051_s0 + $0x8] sm:$0xff]  ;;  %v163_v6 = vld [vmem:[%s3053_s2 + $0x70] sm:$0xff]  ;;  %v3056_v35 = vmov 0.0   ;;  %v1988_v47 = vmov 1.0  }
   0xf   :  { %60 = vperm.xlu1 %1832, %v2021_v1   ;;  %54 = vperm.xlu0 %1831, %v2026_v2   ;;  %v164_v5 = vld [vmem:[%s3053_s2 + $0x78] sm:$0xff]  ;;  %v2048_v7 = vld [vmem:[%s3051_s0 + $0x28] sm:$0xff]  ;;  %v2053_v8 = vld [vmem:[%s3051_s0 + $0x20] sm:$0xff]  ;;  %391 = vst.msk [vmem:[#allocation6] sm:$0xff] %vm3071_vm0, %v3056_v35  ;;  %v2256_v44 = vand.u32 127, %v51_v43  ;;  %v2267_v58 = vshrl.u32 %v51_v43, 7 }
  0x10   :  { %1712 = vmatprep.subr.mxu0 %v164_v5  ;;  %v162_v9 = vld [vmem:[%s3053_s2 + $0x68] sm:$0xff]  ;;  %v2063_v10 = vld [vmem:[%s3051_s0 + $0x38] sm:$0xff]  ;;  %v2068_v11 = vld [vmem:[%s3051_s0 + $0x30] sm:$0xff]  ;;  %359 = vst.msk [vmem:[#allocation4] sm:$0xff] %vm3071_vm0, %v3056_v35 }
  0x11   :  { %1713 = vmatpush3.msra.mxu0 %v164_v5  ;;  %v161_v12 = vld [vmem:[%s3053_s2 + $0x60] sm:$0xff]  ;;  %v160_v13 = vld [vmem:[%s3053_s2 + $0x58] sm:$0xff]  ;;  %v44_v14 = vld [vmem:[%s3051_s0 + $0x48] sm:$0xff]  ;;  %360 = vst.msk [vmem:[#allocation4 + $0x8] sm:$0xff] %vm3071_vm0, %v3056_v35  ;;  %v587_v61 = vadd.s32 8, %v2267_v58  ;;  %v589_v62 = vadd.s32 24, %v2267_v58 }
  0x12   :  { %1714 = vmatprep.subr.mxu0 %v163_v6  ;;  %v2084_v15 = vld [vmem:[%s3051_s0 + $0x40] sm:$0xff]  ;;  %v159_v16 = vld [vmem:[%s3053_s2 + $0x50] sm:$0xff]  ;;  %v46_v17 = vld [vmem:[%s3051_s0 + $0x58] sm:$0xff]  ;;  %361 = vst.msk [vmem:[#allocation4 + $0x10] sm:$0xff] %vm3071_vm0, %v3056_v35  ;;  %vm3077_vm14 = vcmp.lt.s32.totalorder %v2256_v44, 16 }
  0x13   :  { %63 = vperm.xlu1 %1832, %v2033_v3   ;;  %57 = vperm.xlu0 %1831, %v36_v4   ;;  %v2096_v18 = vld [vmem:[%s3051_s0 + $0x50] sm:$0xff]  ;;  %v158_v19 = vld [vmem:[%s3053_s2 + $0x48] sm:$0xff]  ;;  %v157_v20 = vld [vmem:[%s3053_s2 + $0x40] sm:$0xff]  ;;  %362 = vst.msk [vmem:[#allocation4 + $0x18] sm:$0xff] %vm3071_vm0, %v3056_v35  ;;  %vm626_vm15 = vcmp.ne.s32.totalorder %v587_v61, %v2256_v44 }
  0x14   :  { %1715 = vmatpush3.msra.mxu0 %v163_v6  ;;  %v2108_v21 = vld [vmem:[%s3051_s0 + $0x68] sm:$0xff]  ;;  %v2113_v22 = vld [vmem:[%s3051_s0 + $0x60] sm:$0xff]  ;;  %v156_v23 = vld [vmem:[%s3053_s2 + $0x38] sm:$0xff]  ;;  %363 = vst.msk [vmem:[#allocation4 + $0x20] sm:$0xff] %vm3071_vm0, %v3056_v35 }
  0x15   :  { %1716 = vmatprep.subr.mxu0 %v162_v9  ;;  %v2123_v24 = vld [vmem:[%s3051_s0 + $0x78] sm:$0xff]  ;;  %v2128_v25 = vld [vmem:[%s3051_s0 + $0x70] sm:$0xff]  ;;  %v154_v27 = vld [vmem:[%s3053_s2 + $0x28] sm:$0xff]  ;;  %364 = vst.msk [vmem:[#allocation4 + $0x28] sm:$0xff] %vm3071_vm0, %v3056_v35 }
  0x16   :  { %1717 = vmatpush3.msra.mxu0 %v162_v9  ;;  %v155_v26 = vld [vmem:[%s3053_s2 + $0x30] sm:$0xff]  ;;  %v153_v28 = vld [vmem:[%s3053_s2 + $0x20] sm:$0xff]  ;;  %v152_v29 = vld [vmem:[%s3053_s2 + $0x18] sm:$0xff]  ;;  %365 = vst.msk [vmem:[#allocation4 + $0x30] sm:$0xff] %vm3071_vm0, %v3056_v35 }
  0x17   :  { %69 = vperm.xlu1 %1832, %v2048_v7   ;;  %66 = vperm.xlu0 %1831, %v2053_v8   ;;  %v151_v30 = vld [vmem:[%s3053_s2 + $0x10] sm:$0xff]  ;;  %v150_v31 = vld [vmem:[%s3053_s2 + $0x8] sm:$0xff]  ;;  %v149_v32 = vld [vmem:[%s3053_s2] sm:$0xff]  ;;  %366 = vst.msk [vmem:[#allocation4 + $0x38] sm:$0xff] %vm3071_vm0, %v3056_v35 }
  0x18   :  { %1718 = vmatprep.subr.mxu0 %v161_v12  ;;  %v438_v33 = vld [vmem:[#allocation7 + $0x78] sm:$0xff]  ;;  %v437_v34 = vld [vmem:[#allocation7 + $0x70] sm:$0xff]  ;;  %367 = vst.msk [vmem:[#allocation4 + $0x40] sm:$0xff] %vm3071_vm0, %v3056_v35  ;;  %368 = vst.msk [vmem:[#allocation4 + $0x48] sm:$0xff] %vm3071_vm0, %v3056_v35 }
  0x19   :  { %1719 = vmatpush3.msra.mxu0 %v161_v12  ;;  %1768 = vmatprep.subr.mxu1 %v438_v33  ;;  %369 = vst.msk [vmem:[#allocation4 + $0x50] sm:$0xff] %vm3071_vm0, %v3056_v35  ;;  %370 = vst.msk [vmem:[#allocation4 + $0x58] sm:$0xff] %vm3071_vm0, %v3056_v35  ;;  %v436_v36 = vld [vmem:[#allocation7 + $0x68] sm:$0xff]  ;;  %v435_v37 = vld [vmem:[#allocation7 + $0x60] sm:$0xff] }
  0x1a   :  { %1720 = vmatprep.subr.mxu0 %v160_v13  ;;  %371 = vst.msk [vmem:[#allocation4 + $0x60] sm:$0xff] %vm3071_vm0, %v3056_v35  ;;  %372 = vst.msk [vmem:[#allocation4 + $0x68] sm:$0xff] %vm3071_vm0, %v3056_v35  ;;  %1769 = vmatpush3.xpose.msra.mxu1 %v438_v33  ;;  %v434_v38 = vld [vmem:[#allocation7 + $0x58] sm:$0xff]  ;;  %v433_v39 = vld [vmem:[#allocation7 + $0x50] sm:$0xff] }
  0x1b   :  { %75 = vperm.xlu1 %1832, %v2063_v10   ;;  %72 = vperm.xlu0 %1831, %v2068_v11   ;;  %373 = vst.msk [vmem:[#allocation4 + $0x70] sm:$0xff] %vm3071_vm0, %v3056_v35  ;;  %374 = vst.msk [vmem:[#allocation4 + $0x78] sm:$0xff] %vm3071_vm0, %v3056_v35  ;;  %v432_v40 = vld [vmem:[#allocation7 + $0x48] sm:$0xff]  ;;  %v431_v41 = vld [vmem:[#allocation7 + $0x40] sm:$0xff] }
  0x1c   :  { %1721 = vmatpush3.msra.mxu0 %v160_v13  ;;  %375 = vst.msk [vmem:[#allocation5] sm:$0xff] %vm3071_vm0, %v3056_v35  ;;  %376 = vst.msk [vmem:[#allocation5 + $0x8] sm:$0xff] %vm3071_vm0, %v3056_v35  ;;  %1770 = vmatprep.subr.mxu1 %v437_v34  ;;  %v430_v42 = vld [vmem:[#allocation7 + $0x38] sm:$0xff] }
  0x1d   :  { %1722 = vmatprep.subr.mxu0 %v159_v16  ;;  %377 = vst.msk [vmem:[#allocation5 + $0x10] sm:$0xff] %vm3071_vm0, %v3056_v35  ;;  %378 = vst.msk [vmem:[#allocation5 + $0x18] sm:$0xff] %vm3071_vm0, %v3056_v35 }
  0x1e   :  { %1723 = vmatpush3.msra.mxu0 %v159_v16  ;;  %379 = vst.msk [vmem:[#allocation5 + $0x20] sm:$0xff] %vm3071_vm0, %v3056_v35  ;;  %380 = vst.msk [vmem:[#allocation5 + $0x28] sm:$0xff] %vm3071_vm0, %v3056_v35  ;;  %1771 = vmatpush3.xpose.msra.mxu1 %v437_v34 }
  0x1f   :  { %81 = vperm.xlu1 %1832, %v44_v14   ;;  %78 = vperm.xlu0 %1831, %v2084_v15   ;;  %381 = vst.msk [vmem:[#allocation5 + $0x30] sm:$0xff] %vm3071_vm0, %v3056_v35  ;;  %382 = vst.msk [vmem:[#allocation5 + $0x38] sm:$0xff] %vm3071_vm0, %v3056_v35 }
  0x20   :  { %1724 = vmatprep.subr.mxu0 %v158_v19  ;;  %383 = vst.msk [vmem:[#allocation5 + $0x40] sm:$0xff] %vm3071_vm0, %v3056_v35  ;;  %384 = vst.msk [vmem:[#allocation5 + $0x48] sm:$0xff] %vm3071_vm0, %v3056_v35  ;;  %1772 = vmatprep.subr.mxu1 %v436_v36 }
  0x21   :  { %1725 = vmatpush3.msra.mxu0 %v158_v19  ;;  %385 = vst.msk [vmem:[#allocation5 + $0x50] sm:$0xff] %vm3071_vm0, %v3056_v35  ;;  %386 = vst.msk [vmem:[#allocation5 + $0x58] sm:$0xff] %vm3071_vm0, %v3056_v35  ;;  %v428_v19 = vld [vmem:[#allocation7 + $0x28] sm:$0xff] }
  0x22   :  { %1726 = vmatprep.subr.mxu0 %v157_v20  ;;  %387 = vst.msk [vmem:[#allocation5 + $0x60] sm:$0xff] %vm3071_vm0, %v3056_v35  ;;  %388 = vst.msk [vmem:[#allocation5 + $0x68] sm:$0xff] %vm3071_vm0, %v3056_v35  ;;  %1773 = vmatpush3.xpose.msra.mxu1 %v436_v36  ;;  %v1287_v36 = vld [vmem:[#allocation6] sm:$0xff] }
  0x23   :  { %87 = vperm.xlu1 %1832, %v46_v17   ;;  %84 = vperm.xlu0 %1831, %v2096_v18   ;;  %389 = vst.msk [vmem:[#allocation5 + $0x70] sm:$0xff] %vm3071_vm0, %v3056_v35  ;;  %390 = vst.msk [vmem:[#allocation5 + $0x78] sm:$0xff] %vm3071_vm0, %v3056_v35 }
  0x24   :  { %1727 = vmatpush3.msra.mxu0 %v157_v20  ;;  %392 = vst.msk [vmem:[#allocation6 + $0x8] sm:$0xff] %vm3071_vm0, %v3056_v35  ;;  %393 = vst.msk [vmem:[#allocation6 + $0x10] sm:$0xff] %vm3071_vm0, %v3056_v35  ;;  %1774 = vmatprep.subr.mxu1 %v435_v37  ;;  %v427_v20 = vld [vmem:[#allocation7 + $0x20] sm:$0xff] }
  0x25   :  { %1728 = vmatprep.subr.mxu0 %v156_v23  ;;  %394 = vst.msk [vmem:[#allocation6 + $0x18] sm:$0xff] %vm3071_vm0, %v3056_v35  ;;  %395 = vst.msk [vmem:[#allocation6 + $0x20] sm:$0xff] %vm3071_vm0, %v3056_v35 }
  0x26   :  { %1729 = vmatpush3.msra.mxu0 %v156_v23  ;;  %396 = vst.msk [vmem:[#allocation6 + $0x28] sm:$0xff] %vm3071_vm0, %v3056_v35  ;;  %397 = vst.msk [vmem:[#allocation6 + $0x30] sm:$0xff] %vm3071_vm0, %v3056_v35  ;;  %1775 = vmatpush3.xpose.msra.mxu1 %v435_v37  ;;  %v425_v23 = vld [vmem:[#allocation7 + $0x10] sm:$0xff] }
  0x27   :  { %93 = vperm.xlu1 %1832, %v2108_v21   ;;  %90 = vperm.xlu0 %1831, %v2113_v22   ;;  %398 = vst.msk [vmem:[#allocation6 + $0x38] sm:$0xff] %vm3071_vm0, %v3056_v35  ;;  %399 = vst.msk [vmem:[#allocation6 + $0x40] sm:$0xff] %vm3071_vm0, %v3056_v35 }
  0x28   :  { %1730 = vmatprep.subr.mxu0 %v155_v26  ;;  %400 = vst.msk [vmem:[#allocation6 + $0x48] sm:$0xff] %vm3071_vm0, %v3056_v35  ;;  %401 = vst.msk [vmem:[#allocation6 + $0x50] sm:$0xff] %vm3071_vm0, %v3056_v35  ;;  %1776 = vmatprep.subr.mxu1 %v434_v38 }
  0x29   :  { %1731 = vmatpush3.msra.mxu0 %v155_v26  ;;  %402 = vst.msk [vmem:[#allocation6 + $0x58] sm:$0xff] %vm3071_vm0, %v3056_v35  ;;  %403 = vst.msk [vmem:[#allocation6 + $0x60] sm:$0xff] %vm3071_vm0, %v3056_v35  ;;  %v424_v26 = vld [vmem:[#allocation7 + $0x8] sm:$0xff] }
  0x2a   :  { %1732 = vmatprep.subr.mxu0 %v154_v27  ;;  %404 = vst.msk [vmem:[#allocation6 + $0x68] sm:$0xff] %vm3071_vm0, %v3056_v35  ;;  %405 = vst.msk [vmem:[#allocation6 + $0x70] sm:$0xff] %vm3071_vm0, %v3056_v35  ;;  %1777 = vmatpush3.xpose.msra.mxu1 %v434_v38 }
  0x2b   :  { %99 = vperm.xlu1 %1832, %v2123_v24   ;;  %96 = vperm.xlu0 %1831, %v2128_v25   ;;  %406 = vst.msk [vmem:[#allocation6 + $0x78] sm:$0xff] %vm3071_vm0, %v3056_v35  ;;  %v1288_v34 = vld [vmem:[#allocation6 + $0x8] sm:$0xff] }
  0x2c   :  { %1733 = vmatpush3.msra.mxu0 %v154_v27  ;;  %1778 = vmatprep.subr.mxu1 %v433_v39  ;;  %v423_v27 = vld [vmem:[#allocation7] sm:$0xff] }
  0x2d   :  { %1734 = vmatprep.subr.mxu0 %v153_v28 }
  0x2e   :  { %1735 = vmatpush3.msra.mxu0 %v153_v28  ;;  %1779 = vmatpush3.xpose.msra.mxu1 %v433_v39 }
  0x2f   :  { %678 = vperm.xlu1 %1832, %v36_v4   ;;  %675 = vperm.xlu0 %1831, %v2026_v2   ;;  %v2285_v2 = vld [vmem:[%s3052_s1] ss:$0 sm:$0xff] }
  0x30   :  { %1736 = vmatprep.subr.mxu0 %v152_v29  ;;  %1780 = vmatprep.subr.mxu1 %v432_v40 }
  0x31   :  { %1737 = vmatpush3.msra.mxu0 %v152_v29 }
  0x32   :  { %1738 = vmatprep.subr.mxu0 %v151_v30  ;;  %1781 = vmatpush3.xpose.msra.mxu1 %v432_v40 }
  0x33   :  { %684 = vperm.xlu1 %1832, %v2033_v3   ;;  %681 = vperm.xlu0 %1831, %v2021_v1   ;;  %v588_v1 = vadd.s32 16, %v2267_v58 }
  0x34   :  { %1739 = vmatpush3.msra.mxu0 %v151_v30  ;;  %1782 = vmatprep.subr.mxu1 %v431_v41 }
  0x35   :  { %1740 = vmatprep.subr.mxu0 %v150_v31 }
  0x36   :  { %1741 = vmatpush3.msra.mxu0 %v150_v31  ;;  %1783 = vmatpush3.xpose.msra.mxu1 %v431_v41  ;;  %v1290_v41 = vld [vmem:[#allocation6 + $0x18] sm:$0xff] }
  0x37   :  { %690 = vperm.xlu1 %1832, %v2048_v7   ;;  %687 = vperm.xlu0 %1831, %v2053_v8   ;;  %v3094_v7 = vmov 0 }
  0x38   :  { %1742 = vmatprep.subr.mxu0 %v149_v32  ;;  %1784 = vmatprep.subr.mxu1 %v430_v42 }
  0x39   :  { %1743 = vmatpush3.msra.mxu0 %v149_v32 }
  0x3a   :  { %1785 = vmatpush3.xpose.msra.mxu1 %v430_v42  ;;  %v1289_v42 = vld [vmem:[#allocation6 + $0x10] sm:$0xff] }
  0x3b   :  { %696 = vperm.xlu1 %1832, %v2063_v10  }
  0x3f   :  { %702 = vperm.xlu1 %1832, %v44_v14  }
  0x43   :  { %708 = vperm.xlu1 %1832, %v46_v17   ;;  %v429_v17 = vld [vmem:[#allocation7 + $0x30] sm:$0xff] }
  0x44   :  { %1786 = vmatprep.subr.mxu1 %v429_v17 }
  0x45   :  { %1787 = vmatpush3.xpose.msra.mxu1 %v429_v17 }
  0x46   :  { %1788 = vmatprep.subr.mxu1 %v428_v19 }
  0x47   :  { %711 = vperm.xlu1 %1832, %v2113_v22   ;;  %v426_v22 = vld [vmem:[#allocation7 + $0x18] sm:$0xff] }
  0x49   :  { %1789 = vmatpush3.xpose.msra.mxu1 %v428_v19 }
  0x4a   :  { %1790 = vmatprep.subr.mxu1 %v427_v20 }
  0x4d   :  { %1791 = vmatpush3.xpose.msra.mxu1 %v427_v20 }
  0x4e   :  { %1792 = vmatprep.subr.mxu1 %v426_v22 }
  0x51   :  { %1793 = vmatpush3.xpose.msra.mxu1 %v426_v22 }
  0x52   :  { %1794 = vmatprep.subr.mxu1 %v425_v23 }
  0x55   :  { %1795 = vmatpush3.xpose.msra.mxu1 %v425_v23 }
  0x56   :  { %1796 = vmatprep.subr.mxu1 %v424_v26 }
  0x59   :  { %1797 = vmatpush3.xpose.msra.mxu1 %v424_v26 }
  0x5a   :  { %1798 = vmatprep.subr.mxu1 %v423_v27 }
  0x5d   :  { %1799 = vmatpush3.xpose.msra.mxu1 %v423_v27 }
  0x8a   :  { %v61_v45 = vpop.permute.xlu1 %60  ;;  %v55_v46 = vpop.permute.xlu0 %54 }
  0x8b   :  { %vm101_vm1 = vcmp.eq.s32.totalorder %v55_v46, %v2256_v44  ;;  %vm103_vm2 = vcmp.eq.s32.totalorder %v61_v45, %v2256_v44 }
  0x8c   :  { %1744 = vmatprep.mubr.msk.f32.mxu0 %vm101_vm1, %v1988_v47 }
  0x8e   :  { %v64_v48 = vpop.permute.xlu1 %63  ;;  %v58_v49 = vpop.permute.xlu0 %57 }
  0x8f   :  { %vm102_vm3 = vcmp.eq.s32.totalorder %v58_v49, %v2256_v44  ;;  %vm104_vm4 = vcmp.eq.s32.totalorder %v64_v48, %v2256_v44 }
  0x90   :  { %1745 = vmatmul.mubr.msk.f32.vlgmr.msra.gmra.mxu0 %vm102_vm3, %v1988_v47  ;;  %vm625_vm3 = vcmp.ne.s32.totalorder %v2267_v58, %v2256_v44 }
  0x91   :  { %1747 = vmatprep.mubr.msk.f32.mxu0 %vm103_vm2, %v1988_v47 }
  0x92   :  { %v70_v50 = vpop.permute.xlu1 %69  ;;  %v67_v51 = vpop.permute.xlu0 %66 }
  0x93   :  { %vm105_vm5 = vcmp.eq.s32.totalorder %v67_v51, %v2256_v44  ;;  %vm106_vm6 = vcmp.eq.s32.totalorder %v70_v50, %v2256_v44 }
  0x94   :  { %1748 = vmatmul.mubr.msk.f32.gmra.mxu0 %vm104_vm4, %v1988_v47  ;;  %vm628_vm4 = vcmp.ne.s32.totalorder %v589_v62, %v2256_v44 }
  0x95   :  { %1750 = vmatprep.mubr.msk.f32.mxu0 %vm105_vm5, %v1988_v47  ;;  %vm2290_vm5 = vmand %vm3077_vm14, %vm626_vm15 }
  0x96   :  { %v76_v52 = vpop.permute.xlu1 %75  ;;  %v73_v53 = vpop.permute.xlu0 %72 }
  0x97   :  { %vm107_vm7 = vcmp.eq.s32.totalorder %v73_v53, %v2256_v44  ;;  %vm108_vm8 = vcmp.eq.s32.totalorder %v76_v52, %v2256_v44 }
  0x98   :  { %1751 = vmatmul.mubr.msk.f32.gmra.mxu0 %vm106_vm6, %v1988_v47  ;;  %vm2296_vm6 = vmand %vm3077_vm14, %vm625_vm3 }
  0x99   :  { %1753 = vmatprep.mubr.msk.f32.mxu0 %vm107_vm7, %v1988_v47 }
  0x9a   :  { %v82_v54 = vpop.permute.xlu1 %81  ;;  %v79_v55 = vpop.permute.xlu0 %78 }
  0x9b   :  { %vm109_vm9 = vcmp.eq.s32.totalorder %v79_v55, %v2256_v44  ;;  %vm110_vm10 = vcmp.eq.s32.totalorder %v82_v54, %v2256_v44 }
  0x9c   :  { %1754 = vmatmul.mubr.msk.f32.gmra.mxu0 %vm108_vm8, %v1988_v47 }
  0x9d   :  { %1756 = vmatprep.mubr.msk.f32.mxu0 %vm109_vm9, %v1988_v47 }
  0x9e   :  { %v88_v56 = vpop.permute.xlu1 %87  ;;  %v85_v57 = vpop.permute.xlu0 %84 }
  0x9f   :  { %vm111_vm11 = vcmp.eq.s32.totalorder %v85_v57, %v2256_v44  ;;  %vm112_vm12 = vcmp.eq.s32.totalorder %v88_v56, %v2256_v44 }
  0xa0   :  { %1757 = vmatmul.mubr.msk.f32.gmra.mxu0 %vm110_vm10, %v1988_v47  ;;  %vm2305_vm10 = vmand %vm3077_vm14, %vm628_vm4 }
  0xa1   :  { %1759 = vmatprep.mubr.msk.f32.mxu0 %vm111_vm11, %v1988_v47  ;;  %v3095_v7 = vsel %vm2305_vm10, 4294967295, %v3094_v7  ;;  %vm627_vm11 = vcmp.ne.s32.totalorder %v588_v1, %v2256_v44 }
  0xa2   :  { %v94_v59 = vpop.permute.xlu1 %93  ;;  %v91_v60 = vpop.permute.xlu0 %90  ;;  %vm2323_vm15 = vmand %vm3077_vm14, %vm627_vm11 }
  0xa3   :  { %vm113_vm13 = vcmp.eq.s32.totalorder %v91_v60, %v2256_v44  ;;  %vm114_vm1 = vcmp.eq.s32.totalorder %v94_v59, %v2256_v44 }
  0xa4   :  { %1760 = vmatmul.mubr.msk.f32.gmra.mxu0 %vm112_vm12, %v1988_v47 }
  0xa5   :  { %1762 = vmatprep.mubr.msk.f32.mxu0 %vm113_vm13, %v1988_v47 }
  0xa6   :  { %v100_v63 = vpop.permute.xlu1 %99  ;;  %v97_v0 = vpop.permute.xlu0 %96 }
  0xa7   :  { %vm115_vm2 = vcmp.eq.s32.totalorder %v97_v0, %v2256_v44  ;;  %vm116_vm7 = vcmp.eq.s32.totalorder %v100_v63, %v2256_v44 }
  0xa8   :  { %1763 = vmatmul.mubr.msk.f32.gmra.mxu0 %vm114_vm1, %v1988_v47 }
  0xa9   :  { %1765 = vmatprep.mubr.msk.f32.mxu0 %vm115_vm2, %v1988_v47 }
  0xaa   :  { %v679_v4 = vpop.permute.xlu1 %678  ;;  %v676_v5 = vpop.permute.xlu0 %675 }
  0xab   :  { %vm727_vm8 = vcmp.eq.s32.totalorder %v679_v4, %v2285_v2  ;;  %vm726_vm9 = vcmp.eq.s32.totalorder %v676_v5, %v2285_v2 }
  0xac   :  { %1766 = vmatmul.mubr.msk.f32.gmra.mxu0 %vm116_vm7, %v1988_v47  ;;  %vm743_vm12 = vmand %vm727_vm8, %vm2290_vm5 }
  0xad   :  { %v2313_v8 = vsel %vm743_vm12, 1.0, %v3056_v35  ;;  %vm742_vm13 = vmand %vm726_vm9, %vm2296_vm6 }
  0xae   :  { %v685_v9 = vpop.permute.xlu1 %684  ;;  %1305 = vadd.xlane.f32.xlu0 %v2313_v8  ;;  %v2319_v10 = vsel %vm742_vm13, 1.0, %v3056_v35  ;;  %v682_v12 = vpop.permute.xlu0 %681 }
  0xaf   :  { %vm729_vm1 = vcmp.eq.s32.totalorder %v685_v9, %v2285_v2  ;;  %1303 = vadd.xlane.f32.xlu1 %v2319_v10  ;;  %vm728_vm2 = vcmp.eq.s32.totalorder %v682_v12, %v2285_v2 }
  0xb0   :  { %vm745_vm3 = vmand %vm729_vm1, %vm2305_vm10 }
  0xb1   :  { %v2333_v14 = vsel %vm745_vm3, 1.0, %v3056_v35  ;;  %vm744_vm4 = vmand %vm728_vm2, %vm2323_vm15 }
  0xb2   :  { %v2338_v16 = vsel %vm744_vm4, 1.0, %v3056_v35  ;;  %v2342_v28 = vpop.permute.xlu1 %690  ;;  %v2350_v32 = vpop.permute.xlu0 %687 }
  0xb3   :  { %1309 = vadd.xlane.f32.xlu1 %v2333_v14  ;;  %1307 = vadd.xlane.f32.xlu0 %v2338_v16  ;;  %vm730_vm8 = vcmp.eq.s32.totalorder %v2350_v32, %v2285_v2 }
  0xb6   :  { %v2344_v29 = vpop.permute.xlu1 %696 }
  0xba   :  { %v2346_v30 = vpop.permute.xlu1 %702 }
  0xbe   :  { %v2348_v31 = vpop.permute.xlu1 %708 }
  0xc2   :  { %v2352_v33 = vpop.permute.xlu1 %711 }
 0x137   :  { %v1306_v37 = vpop.xlane.xlu0 %1305 }
 0x138   :  { %v1304_v38 = vpop.xlane.xlu1 %1303  ;;  %v1336_v39 = vadd.f32 %v1306_v37, %v1288_v34 }
 0x139   :  { %v1335_v40 = vadd.f32 %v1304_v38, %v1287_v36 }
 0x13a   :  { %1352 = vst.msk [vmem:[#allocation6 + $0x8] sm:$0xff] %vm3071_vm0, %v1336_v39  ;;  %v1989_v39 = vmov -inf  }
 0x13b   :  { %1351 = vst.msk [vmem:[#allocation6] sm:$0xff] %vm3071_vm0, %v1335_v40  ;;  %344 = vst.msk [vmem:[#allocation3 + $0x8] sm:$0xff] %vm3071_vm0, %v1989_v39 }
 0x13c   :  { %v1310_v43 = vpop.xlane.xlu1 %1309  ;;  %v1308_v45 = vpop.xlane.xlu0 %1307  ;;  %343 = vst.msk [vmem:[#allocation3] sm:$0xff] %vm3071_vm0, %v1989_v39  ;;  %345 = vst.msk [vmem:[#allocation3 + $0x10] sm:$0xff] %vm3071_vm0, %v1989_v39 }
 0x13d   :  { %v1338_v46 = vadd.f32 %v1310_v43, %v1290_v41  ;;  %v1337_v47 = vadd.f32 %v1308_v45, %v1289_v42  ;;  %346 = vst.msk [vmem:[#allocation3 + $0x18] sm:$0xff] %vm3071_vm0, %v1989_v39  ;;  %347 = vst.msk [vmem:[#allocation3 + $0x20] sm:$0xff] %vm3071_vm0, %v1989_v39 }
 0x13e   :  { %348 = vst.msk [vmem:[#allocation3 + $0x28] sm:$0xff] %vm3071_vm0, %v1989_v39  ;;  %349 = vst.msk [vmem:[#allocation3 + $0x30] sm:$0xff] %vm3071_vm0, %v1989_v39 }
 0x13f   :  { %1354 = vst.msk [vmem:[#allocation6 + $0x18] sm:$0xff] %vm3071_vm0, %v1338_v46  ;;  %1353 = vst.msk [vmem:[#allocation6 + $0x10] sm:$0xff] %vm3071_vm0, %v1337_v47 }
 0x140   :  { %350 = vst.msk [vmem:[#allocation3 + $0x38] sm:$0xff] %vm3071_vm0, %v1989_v39  ;;  %351 = vst.msk [vmem:[#allocation3 + $0x40] sm:$0xff] %vm3071_vm0, %v1989_v39 }
 0x141   :  { %352 = vst.msk [vmem:[#allocation3 + $0x48] sm:$0xff] %vm3071_vm0, %v1989_v39  ;;  %353 = vst.msk [vmem:[#allocation3 + $0x50] sm:$0xff] %vm3071_vm0, %v1989_v39 }
 0x142   :  { %354 = vst.msk [vmem:[#allocation3 + $0x58] sm:$0xff] %vm3071_vm0, %v1989_v39  ;;  %355 = vst.msk [vmem:[#allocation3 + $0x60] sm:$0xff] %vm3071_vm0, %v1989_v39  ;;  %v2476_v32 = vld [vmem:[#allocation3 + $0x8] sm:$0xff] }
 0x143   :  { %356 = vst.msk [vmem:[#allocation3 + $0x68] sm:$0xff] %vm3071_vm0, %v1989_v39  ;;  %357 = vst.msk [vmem:[#allocation3 + $0x70] sm:$0xff] %vm3071_vm0, %v1989_v39 }
 0x144   :  { %358 = vst.msk [vmem:[#allocation3 + $0x78] sm:$0xff] %vm3071_vm0, %v1989_v39  ;;  %v2501_v39 = vld [vmem:[#allocation3 + $0x20] sm:$0xff] }
 0x150   :  { %v1746_v48 = vpop.f32.mrf.mxu0 }
 0x151   :  { %v311_v51 = vmul.f32 14.285714, %v1746_v48 }
 0x152   :  { %v231_v49 = vpop.f32.mrf.mxu0 }
 0x153   :  { %v310_v50 = vmul.f32 14.285714, %v231_v49 }
 0x154   :  { %v1749_v52 = vpop.f32.mrf.mxu0 }
 0x155   :  { %1800 = vmatprep.mubr.f32.mxu1 %v310_v50  ;;  %v313_v55 = vmul.f32 14.285714, %v1749_v52 }
 0x156   :  { %v241_v53 = vpop.f32.mrf.mxu0  ;;  %1801 = vmatmul.mubr.f32.vlgmr.msra.gmra.mxu1 %v311_v51 }
 0x157   :  { %v312_v54 = vmul.f32 14.285714, %v241_v53 }
 0x158   :  { %v1752_v56 = vpop.f32.mrf.mxu0 }
 0x159   :  { %1803 = vmatprep.mubr.f32.mxu1 %v312_v54  ;;  %v315_v60 = vmul.f32 14.285714, %v1752_v56 }
 0x15a   :  { %v251_v57 = vpop.f32.mrf.mxu0  ;;  %1804 = vmatmul.mubr.f32.gmra.mxu1 %v313_v55 }
 0x15b   :  { %v314_v59 = vmul.f32 14.285714, %v251_v57 }
 0x15c   :  { %v1755_v61 = vpop.f32.mrf.mxu0 }
 0x15d   :  { %1806 = vmatprep.mubr.f32.mxu1 %v314_v59  ;;  %v317_v0 = vmul.f32 14.285714, %v1755_v61 }
 0x15e   :  { %v261_v62 = vpop.f32.mrf.mxu0  ;;  %1807 = vmatmul.mubr.f32.gmra.mxu1 %v315_v60 }
 0x15f   :  { %v316_v63 = vmul.f32 14.285714, %v261_v62 }
 0x160   :  { %v1758_v1 = vpop.f32.mrf.mxu0 }
 0x161   :  { %1809 = vmatprep.mubr.f32.mxu1 %v316_v63  ;;  %v319_v9 = vmul.f32 14.285714, %v1758_v1 }
 0x162   :  { %v271_v4 = vpop.f32.mrf.mxu0  ;;  %1810 = vmatmul.mubr.f32.gmra.mxu1 %v317_v0 }
 0x163   :  { %v318_v5 = vmul.f32 14.285714, %v271_v4 }
 0x164   :  { %v1761_v12 = vpop.f32.mrf.mxu0 }
 0x165   :  { %1812 = vmatprep.mubr.f32.mxu1 %v318_v5  ;;  %v321_v20 = vmul.f32 14.285714, %v1761_v12  ;;  %v590_v5 = vadd.s32 32, %v2267_v58 }
 0x166   :  { %v281_v17 = vpop.f32.mrf.mxu0  ;;  %1813 = vmatmul.mubr.f32.gmra.mxu1 %v319_v9 }
 0x167   :  { %v320_v19 = vmul.f32 14.285714, %v281_v17  ;;  %vm629_vm7 = vcmp.ne.s32.totalorder %v590_v5, %v2256_v44 }
 0x168   :  { %v1764_v22 = vpop.f32.mrf.mxu0  ;;  %vm2457_vm9 = vmand %vm3077_vm14, %vm629_vm7 }
 0x169   :  { %1815 = vmatprep.mubr.f32.mxu1 %v320_v19  ;;  %v323_v27 = vmul.f32 14.285714, %v1764_v22  ;;  %vm746_vm11 = vmand %vm730_vm8, %vm2457_vm9 }
 0x16a   :  { %v291_v23 = vpop.f32.mrf.mxu0  ;;  %1816 = vmatmul.mubr.f32.gmra.mxu1 %v321_v20 }
 0x16b   :  { %v322_v26 = vmul.f32 14.285714, %v291_v23  ;;  %v3098_v23 = vmov 0 }
 0x16c   :  { %v1767_v34 = vpop.f32.mrf.mxu0  ;;  %v3099_v23 = vsel %vm2457_vm9, 4294967295, %v3098_v23 }
 0x16d   :  { %1818 = vmatprep.mubr.f32.mxu1 %v322_v26  ;;  %v325_v38 = vmul.f32 14.285714, %v1767_v34 }
 0x16e   :  { %v301_v36 = vpop.f32.mrf.mxu0  ;;  %1819 = vmatmul.mubr.f32.gmra.mxu1 %v323_v27  ;;  %v2467_v27 = vsel %vm746_vm11, 1.0, %v3056_v35  ;;  %v2595_v35 = vld [vmem:[#allocation3 + $0x70] sm:$0xff] }
 0x16f   :  { %v324_v37 = vmul.f32 14.285714, %v301_v36  ;;  %v2478_v36 = vld [vmem:[#allocation3] sm:$0xff]  ;;  %3117 = vst [vmem:[#allocation27_spill] sm:$0xff] %v2595_v35 }
 0x171   :  { %1821 = vmatprep.mubr.f32.mxu1 %v324_v37 }
 0x172   :  { %1822 = vmatmul.mubr.f32.gmra.mxu1 %v325_v38 }
 0x216   :  { %v2374_v40 = vpop.f32.mrf.mxu1 }
 0x217   :  { %v791_v41 = vsel %vm3077_vm14, %v2374_v40, -inf }
 0x218   :  { %v2379_v42 = vpop.f32.mrf.mxu1  ;;  %808 = vmax.xlane.f32.xlu1 %v791_v41  ;;  %v2503_v41 = vld [vmem:[#allocation3 + $0x10] sm:$0xff] }
 0x219   :  { %v790_v43 = vsel %vm3077_vm14, %v2379_v42, -inf }
 0x21a   :  { %v2384_v45 = vpop.f32.mrf.mxu1  ;;  %806 = vmax.xlane.f32.xlu0 %v790_v43  ;;  %v2575_v43 = vld [vmem:[#allocation3 + $0x60] sm:$0xff] }
 0x21b   :  { %v793_v47 = vsel %vm3077_vm14, %v2384_v45, -inf  ;;  %3113 = vst [vmem:[#allocation23_spill] sm:$0xff] %v2575_v43 }
 0x21c   :  { %v2386_v46 = vpop.f32.mrf.mxu1 }
 0x21d   :  { %v792_v51 = vsel %vm3077_vm14, %v2386_v46, -inf }
 0x21e   :  { %v2391_v48 = vpop.f32.mrf.mxu1  ;;  %812 = vmax.xlane.f32.xlu0 %v793_v47 }
 0x21f   :  { %v795_v55 = vsel %vm3077_vm14, %v2391_v48, -inf }
 0x220   :  { %v2393_v49 = vpop.f32.mrf.mxu1 }
 0x221   :  { %v794_v50 = vsel %vm3077_vm14, %v2393_v49, -inf }
 0x222   :  { %v2401_v52 = vpop.f32.mrf.mxu1  ;;  %814 = vmax.xlane.f32.xlu1 %v794_v50  ;;  %810 = vmax.xlane.f32.xlu0 %v792_v51 }
 0x223   :  { %v797_v60 = vsel %vm3077_vm14, %v2401_v52, -inf }
 0x224   :  { %v2403_v53 = vpop.f32.mrf.mxu1 }
 0x225   :  { %v796_v54 = vsel %vm3077_vm14, %v2403_v53, -inf }
 0x226   :  { %v2411_v56 = vpop.f32.mrf.mxu1  ;;  %818 = vmax.xlane.f32.xlu1 %v796_v54  ;;  %816 = vmax.xlane.f32.xlu0 %v795_v55  ;;  %v2516_v55 = vld [vmem:[#allocation3 + $0x30] sm:$0xff] }
 0x227   :  { %v799_v0 = vsel %vm3077_vm14, %v2411_v56, -inf  ;;  %3101 = vst [vmem:[#allocation11_spill] sm:$0xff] %v2516_v55 }
 0x228   :  { %v2413_v57 = vpop.f32.mrf.mxu1 }
 0x229   :  { %v798_v59 = vsel %vm3077_vm14, %v2413_v57, -inf }
 0x22a   :  { %v2421_v61 = vpop.f32.mrf.mxu1  ;;  %822 = vmax.xlane.f32.xlu1 %v798_v59  ;;  %820 = vmax.xlane.f32.xlu0 %v797_v60  ;;  %v2518_v59 = vld [vmem:[#allocation3 + $0x28] sm:$0xff] }
 0x22b   :  { %v801_v12 = vsel %vm3077_vm14, %v2421_v61, -inf  ;;  %3102 = vst [vmem:[#allocation12_spill] sm:$0xff] %v2518_v59 }
 0x22c   :  { %v2423_v62 = vpop.f32.mrf.mxu1 }
 0x22d   :  { %v800_v63 = vsel %vm3077_vm14, %v2423_v62, -inf }
 0x22e   :  { %v2431_v1 = vpop.f32.mrf.mxu1  ;;  %826 = vmax.xlane.f32.xlu1 %v800_v63  ;;  %824 = vmax.xlane.f32.xlu0 %v799_v0  ;;  %v2577_v63 = vld [vmem:[#allocation3 + $0x58] sm:$0xff] }
 0x22f   :  { %v803_v22 = vsel %vm3077_vm14, %v2431_v1, -inf  ;;  %3114 = vst [vmem:[#allocation24_spill] sm:$0xff] %v2577_v63 }
 0x230   :  { %v2433_v4 = vpop.f32.mrf.mxu1 }
 0x231   :  { %v802_v9 = vsel %vm3077_vm14, %v2433_v4, -inf }
 0x232   :  { %v2442_v17 = vpop.f32.mrf.mxu1  ;;  %830 = vmax.xlane.f32.xlu1 %v802_v9  ;;  %828 = vmax.xlane.f32.xlu0 %v801_v12 }
 0x233   :  { %v805_v26 = vsel %vm3077_vm14, %v2442_v17, -inf }
 0x234   :  { %v2444_v19 = vpop.f32.mrf.mxu1 }
 0x235   :  { %v804_v20 = vsel %vm3077_vm14, %v2444_v19, -inf }
 0x236   :  { %834 = vmax.xlane.f32.xlu1 %v804_v20  ;;  %832 = vmax.xlane.f32.xlu0 %v803_v22  ;;  %v2535_v20 = vld [vmem:[#allocation3 + $0x40] sm:$0xff]  ;;  %v2537_v22 = vld [vmem:[#allocation3 + $0x38] sm:$0xff] }
 0x237   :  { %3105 = vst [vmem:[#allocation15_spill] sm:$0xff] %v2535_v20  ;;  %3106 = vst [vmem:[#allocation16_spill] sm:$0xff] %v2537_v22 }
 0x23a   :  { %836 = vmax.xlane.f32.xlu0 %v805_v26 }
 0x23e   :  { %1311 = vadd.xlane.f32.xlu0 %v2467_v27 }
 0x247   :  { %720 = vperm.xlu1 %1832, %v2123_v24  }
 0x254   :  { %693 = vperm.xlu0 %1831, %v2068_v11  }
 0x258   :  { %699 = vperm.xlu0 %1831, %v2084_v15  }
 0x25c   :  { %705 = vperm.xlu0 %1831, %v2096_v18   ;;  %v2491_v18 = vld [vmem:[#allocation3 + $0x18] sm:$0xff] }
 0x260   :  { %714 = vperm.xlu0 %1831, %v2108_v21  }
 0x264   :  { %717 = vperm.xlu0 %1831, %v2128_v25  }
 0x2a1   :  { %v809_v34 = vpop.xlane.xlu1 %808 }
 0x2a2   :  { %v2481_v37 = vmax.f32 %v2476_v32, %v809_v34 }
 0x2a3   :  { %v807_v38 = vpop.xlane.xlu0 %806 }
 0x2a4   :  { %1368 = vst.msk [vmem:[#allocation3 + $0x8] sm:$0xff] %vm3071_vm0, %v2481_v37  ;;  %v2488_v15 = vmax.f32 %v2478_v36, %v807_v38  ;;  %925 = vperm.xlu1 %1832, %v2481_v37  }
 0x2a6   :  { %1367 = vst.msk [vmem:[#allocation3] sm:$0xff] %vm3071_vm0, %v2488_v15 }
 0x2a7   :  { %v813_v24 = vpop.xlane.xlu0 %812 }
 0x2a8   :  { %v2498_v25 = vmax.f32 %v2491_v18, %v813_v24  ;;  %920 = vperm.xlu1 %1832, %v2488_v15  }
 0x2aa   :  { %1370 = vst.msk [vmem:[#allocation3 + $0x18] sm:$0xff] %vm3071_vm0, %v2498_v25 }
 0x2ab   :  { %v815_v47 = vpop.xlane.xlu1 %814  ;;  %v811_v50 = vpop.xlane.xlu0 %810 }
 0x2ac   :  { %v2510_v51 = vmax.f32 %v2501_v39, %v815_v47  ;;  %v2513_v54 = vmax.f32 %v2503_v41, %v811_v50  ;;  %935 = vperm.xlu1 %1832, %v2498_v25  }
 0x2ae   :  { %3100 = vst [vmem:[#allocation10_spill] sm:$0xff] %v2510_v51  ;;  %1371 = vst.msk [vmem:[#allocation3 + $0x20] sm:$0xff] %vm3071_vm0, %v2510_v51  ;;  %930 = vperm.xlu0 %1831, %v2513_v54  }
 0x2af   :  { %1369 = vst.msk [vmem:[#allocation3 + $0x10] sm:$0xff] %vm3071_vm0, %v2513_v54  ;;  %v819_v0 = vpop.xlane.xlu1 %818  ;;  %v817_v5 = vpop.xlane.xlu0 %816 }
 0x2b0   :  { %v2530_v9 = vmax.f32 %v2516_v55, %v819_v0  ;;  %v2533_v12 = vmax.f32 %v2518_v59, %v817_v5  ;;  %v2555_v0 = vld [vmem:[#allocation3 + $0x50] sm:$0xff]  ;;  %v2557_v5 = vld [vmem:[#allocation3 + $0x48] sm:$0xff] }
 0x2b1   :  { %3109 = vst [vmem:[#allocation19_spill] sm:$0xff] %v2555_v0  ;;  %3110 = vst [vmem:[#allocation20_spill] sm:$0xff] %v2557_v5 }
 0x2b2   :  { %3103 = vst [vmem:[#allocation13_spill] sm:$0xff] %v2530_v9  ;;  %3104 = vst [vmem:[#allocation14_spill] sm:$0xff] %v2533_v12  ;;  %940 = vperm.xlu0 %1831, %v2510_v51   ;;  %945 = vperm.xlu1 %1832, %v2533_v12  }
 0x2b3   :  { %1373 = vst.msk [vmem:[#allocation3 + $0x30] sm:$0xff] %vm3071_vm0, %v2530_v9  ;;  %1372 = vst.msk [vmem:[#allocation3 + $0x28] sm:$0xff] %vm3071_vm0, %v2533_v12  ;;  %v823_v38 = vpop.xlane.xlu1 %822  ;;  %v821_v24 = vpop.xlane.xlu0 %820 }
 0x2b4   :  { %v2550_v47 = vmax.f32 %v2535_v20, %v823_v38  ;;  %v2553_v50 = vmax.f32 %v2537_v22, %v821_v24 }
 0x2b6   :  { %3107 = vst [vmem:[#allocation17_spill] sm:$0xff] %v2550_v47  ;;  %3108 = vst [vmem:[#allocation18_spill] sm:$0xff] %v2553_v50  ;;  %950 = vperm.xlu0 %1831, %v2530_v9   ;;  %955 = vperm.xlu1 %1832, %v2553_v50   ;;  %v601_v9 = vadd.s32 120, %v2267_v58 }
 0x2b7   :  { %1375 = vst.msk [vmem:[#allocation3 + $0x40] sm:$0xff] %vm3071_vm0, %v2550_v47  ;;  %1374 = vst.msk [vmem:[#allocation3 + $0x38] sm:$0xff] %vm3071_vm0, %v2553_v50  ;;  %v827_v38 = vpop.xlane.xlu1 %826  ;;  %v825_v24 = vpop.xlane.xlu0 %824 }
 0x2b8   :  { %v2570_v60 = vmax.f32 %v2555_v0, %v827_v38  ;;  %v2573_v26 = vmax.f32 %v2557_v5, %v825_v24  ;;  %v2597_v0 = vld [vmem:[#allocation3 + $0x68] sm:$0xff] }
 0x2b9   :  { %3118 = vst [vmem:[#allocation28_spill] sm:$0xff] %v2597_v0 }
 0x2ba   :  { %3111 = vst [vmem:[#allocation21_spill] sm:$0xff] %v2570_v60  ;;  %3112 = vst [vmem:[#allocation22_spill] sm:$0xff] %v2573_v26  ;;  %960 = vperm.xlu0 %1831, %v2550_v47   ;;  %965 = vperm.xlu1 %1832, %v2573_v26   ;;  %v595_v47 = vadd.s32 72, %v2267_v58 }
 0x2bb   :  { %1377 = vst.msk [vmem:[#allocation3 + $0x50] sm:$0xff] %vm3071_vm0, %v2570_v60  ;;  %1376 = vst.msk [vmem:[#allocation3 + $0x48] sm:$0xff] %vm3071_vm0, %v2573_v26  ;;  %v831_v38 = vpop.xlane.xlu1 %830  ;;  %v829_v24 = vpop.xlane.xlu0 %828 }
 0x2bc   :  { %v2590_v11 = vmax.f32 %v2575_v43, %v831_v38  ;;  %v2593_v34 = vmax.f32 %v2577_v63, %v829_v24  ;;  %v2615_v43 = vld [vmem:[#allocation3 + $0x78] sm:$0xff]  ;;  %vm634_vm10 = vcmp.ne.s32.totalorder %v595_v47, %v2256_v44 }
 0x2bd   :  { %3121 = vst [vmem:[#allocation31_spill] sm:$0xff] %v2615_v43 }
 0x2be   :  { %3115 = vst [vmem:[#allocation25_spill] sm:$0xff] %v2590_v11  ;;  %3116 = vst [vmem:[#allocation26_spill] sm:$0xff] %v2593_v34  ;;  %970 = vperm.xlu0 %1831, %v2570_v60   ;;  %975 = vperm.xlu1 %1832, %v2593_v34   ;;  %v591_v60 = vadd.s32 40, %v2267_v58 }
 0x2bf   :  { %1379 = vst.msk [vmem:[#allocation3 + $0x60] sm:$0xff] %vm3071_vm0, %v2590_v11  ;;  %1378 = vst.msk [vmem:[#allocation3 + $0x58] sm:$0xff] %vm3071_vm0, %v2593_v34  ;;  %v835_v38 = vpop.xlane.xlu1 %834  ;;  %v833_v24 = vpop.xlane.xlu0 %832  ;;  %v3123_v34 = vmov 0 }
 0x2c0   :  { %v2610_v5 = vmax.f32 %v2595_v35, %v835_v38  ;;  %v2613_v21 = vmax.f32 %v2597_v0, %v833_v24  ;;  %v1291_v24 = vld [vmem:[#allocation6 + $0x20] sm:$0xff]  ;;  %vm630_vm4 = vcmp.ne.s32.totalorder %v591_v60, %v2256_v44 }
 0x2c2   :  { %3119 = vst [vmem:[#allocation29_spill] sm:$0xff] %v2610_v5  ;;  %3120 = vst [vmem:[#allocation30_spill] sm:$0xff] %v2613_v21  ;;  %980 = vperm.xlu0 %1831, %v2590_v11   ;;  %985 = vperm.xlu1 %1832, %v2613_v21  }
 0x2c3   :  { %1381 = vst.msk [vmem:[#allocation3 + $0x70] sm:$0xff] %vm3071_vm0, %v2610_v5  ;;  %1380 = vst.msk [vmem:[#allocation3 + $0x68] sm:$0xff] %vm3071_vm0, %v2613_v21  ;;  %v837_v38 = vpop.xlane.xlu0 %836  ;;  %v592_v21 = vadd.s32 48, %v2267_v58 }
 0x2c4   :  { %v2626_v35 = vmax.f32 %v2615_v43, %v837_v38  ;;  %v594_v38 = vadd.s32 64, %v2267_v58  ;;  %v3128_v43 = vmov 0 }
 0x2c5   :  { %vm631_vm12 = vcmp.ne.s32.totalorder %v592_v21, %v2256_v44  ;;  %v3125_v21 = vmov 0 }
 0x2c6   :  { %3122 = vst [vmem:[#allocation32_spill] sm:$0xff] %v2626_v35  ;;  %1382 = vst.msk [vmem:[#allocation3 + $0x78] sm:$0xff] %vm3071_vm0, %v2626_v35  ;;  %995 = vperm.xlu1 %1832, %v2626_v35   ;;  %vm633_vm2 = vcmp.ne.s32.totalorder %v594_v38, %v2256_v44  ;;  %v3127_v38 = vmov 0.0  }
 0x2c7   :  { %v1312_v26 = vpop.xlane.xlu0 %1311  ;;  %vm2641_vm1 = vmand %vm3077_vm14, %vm631_vm12  ;;  %v1634_v3 = vsel %vm2323_vm15, 1.0, %v3127_v38 }
 0x2c8   :  { %v1339_v0 = vadd.f32 %v1312_v26, %v1291_v24  ;;  %v3124_v34 = vsel %vm2641_vm1, 4294967295, %v3123_v34  ;;  %v593_v24 = vadd.s32 56, %v2267_v58  ;;  %vm2655_vm8 = vmand %vm3077_vm14, %vm633_vm2 }
 0x2c9   :  { %v3126_v21 = vsel %vm2655_vm8, 4294967295, %v3125_v21  ;;  %vm2665_vm12 = vmand %vm3077_vm14, %vm630_vm4  ;;  %vm731_vm4 = vcmp.eq.s32.totalorder %v2342_v28, %v2285_v2 }
 0x2ca   :  { %1355 = vst.msk [vmem:[#allocation6 + $0x20] sm:$0xff] %vm3071_vm0, %v1339_v0  ;;  %v596_v0 = vadd.s32 80, %v2267_v58  ;;  %v3129_v43 = vsel %vm2665_vm12, 4294967295, %v3128_v43 }
 0x2cb   :  { %vm3152_vm15 = vnez %v3129_v43 }
 0x2cc   :  { %vm635_vm11 = vcmp.ne.s32.totalorder %v596_v0, %v2256_v44  ;;  %v3132_v0 = vmov 0 }
 0x2cf   :  { %v694_v11 = vpop.permute.xlu0 %693 }
 0x2d0   :  { %vm732_vm13 = vcmp.eq.s32.totalorder %v694_v11, %v2285_v2  ;;  %v598_v11 = vadd.s32 96, %v2267_v58 }
 0x2d1   :  { %vm748_vm3 = vmand %vm732_vm13, %vm2641_vm1  ;;  %vm632_vm13 = vcmp.ne.s32.totalorder %v593_v24, %v2256_v44  ;;  %v600_v24 = vadd.s32 112, %v2267_v58 }
 0x2d2   :  { %v2661_v35 = vsel %vm748_vm3, 1.0, %v3127_v38  ;;  %vm637_vm0 = vcmp.ne.s32.totalorder %v598_v11, %v2256_v44  ;;  %vm2677_vm3 = vmand %vm3077_vm14, %vm635_vm11  ;;  %vm733_vm11 = vcmp.eq.s32.totalorder %v2344_v29, %v2285_v2  ;;  %v597_v29 = vadd.s32 88, %v2267_v58 }
 0x2d3   :  { %v700_v63 = vpop.permute.xlu0 %699  ;;  %vm2685_vm9 = vmand %vm3077_vm14, %vm632_vm13 }
 0x2d4   :  { %vm734_vm7 = vcmp.eq.s32.totalorder %v700_v63, %v2285_v2  ;;  %v3130_v63 = vmov 0  ;;  %v3133_v0 = vsel %vm2685_vm9, 4294967295, %v3132_v0 }
 0x2d5   :  { %vm750_vm2 = vmand %vm734_vm7, %vm2655_vm8  ;;  %v3131_v63 = vsel %vm2677_vm3, 4294967295, %v3130_v63 }
 0x2d6   :  { %v2691_v11 = vsel %vm750_vm2, 1.0, %v3127_v38  ;;  %vm2695_vm7 = vmand %vm3077_vm14, %vm637_vm0  ;;  %vm738_vm2 = vcmp.eq.s32.totalorder %v2352_v33, %v2285_v2  ;;  %vm639_vm0 = vcmp.ne.s32.totalorder %v600_v24, %v2256_v44  ;;  %v3176_v24 = vsub.f32 %v2476_v32, %v2481_v37 }
 0x2d7   :  { %v706_v26 = vpop.permute.xlu0 %705  ;;  %vm747_vm8 = vmand %vm731_vm4, %vm2665_vm12  ;;  %v1644_v47 = vsel %vm2695_vm7, 1.0, %v3127_v38 }
 0x2d8   :  { %vm736_vm1 = vcmp.eq.s32.totalorder %v706_v26, %v2285_v2  ;;  %vm749_vm14 = vmand %vm733_vm11, %vm2685_vm9  ;;  %v1621_v33 = vsel %vm747_vm8, 1.0, %v3127_v38  ;;  %vm735_vm11 = vcmp.eq.s32.totalorder %v2346_v30, %v2285_v2  ;;  %vm636_vm8 = vcmp.ne.s32.totalorder %v597_v29, %v2256_v44 }
 0x2d9   :  { %vm752_vm13 = vmand %vm736_vm1, %vm2677_vm3  ;;  %v2743_v22 = vsel %vm749_vm14, 1.0, %v3127_v38 }
 0x2da   :  { %v2711_v20 = vsel %vm752_vm13, 1.0, %v3127_v38  ;;  %vm754_vm1 = vmand %vm738_vm2, %vm2695_vm7  ;;  %vm3136_vm13 = vcmp.lt.s32.totalorder %v2256_v44, 16 }
 0x2db   :  { %v715_v60 = vpop.permute.xlu0 %714  ;;  %vm2724_vm3 = vmand %vm3136_vm13, %vm639_vm0  ;;  %v2737_v50 = vsel %vm754_vm1, 1.0, %v3127_v38 }
 0x2dc   :  { %vm3139_vm9 = vmmov %vm3136_vm13 }
 0x2dd   :  { %vm2732_vm12 = vmand %vm3139_vm9, %vm634_vm10  ;;  %vm737_vm9 = vcmp.eq.s32.totalorder %v2348_v31, %v2285_v2  ;;  %v1208_v31 = vmul.f32 %v2374_v40, %v2313_v8  ;;  %v1210_v8 = vmul.f32 %v2384_v45, %v2333_v14 }
 0x2de   :  { %vm751_vm10 = vmand %vm735_vm11, %vm2732_vm12 }
 0x2df   :  { %v718_v28 = vpop.permute.xlu0 %717  ;;  %vm3142_vm0 = vmmov %vm3136_vm13  ;;  %v2765_v55 = vsel %vm751_vm10, 1.0, %v3127_v38  ;;  %vm739_vm13 = vcmp.eq.s32.totalorder %v715_v60, %v2285_v2  ;;  %v1295_v60 = vld [vmem:[#allocation6 + $0x40] sm:$0xff] }
 0x2e0   :  { %vm740_vm4 = vcmp.eq.s32.totalorder %v718_v28, %v2285_v2  ;;  %v599_v28 = vadd.s32 104, %v2267_v58  ;;  %vm2754_vm1 = vmand %vm3142_vm0, %vm636_vm8  ;;  %v721_v58 = vpop.permute.xlu1 %720 }
 0x2e1   :  { %1315 = vadd.xlane.f32.xlu0 %v2661_v35  ;;  %vm756_vm2 = vmand %vm740_vm4, %vm2724_vm3 }
 0x2e2   :  { %v2759_v29 = vsel %vm756_vm2, 1.0, %v3127_v38  ;;  %vm638_vm14 = vcmp.ne.s32.totalorder %v599_v28, %v2256_v44  ;;  %vm753_vm4 = vmand %vm737_vm9, %vm2754_vm1  ;;  %vm640_vm2 = vcmp.ne.s32.totalorder %v601_v9, %v2256_v44  ;;  %vm741_vm9 = vcmp.eq.s32.totalorder %v721_v58, %v2285_v2 }
 0x2e3   :  { %vm3145_vm11 = vmmov %vm3142_vm0  ;;  %v2781_v12 = vsel %vm753_vm4, 1.0, %v3127_v38  ;;  %v1212_v2 = vmul.f32 %v2391_v48, %v1621_v33  ;;  %v1207_v44 = vmul.f32 %v2319_v10, %v2379_v42  ;;  %v1211_v58 = vmul.f32 %v2467_v27, %v2393_v49 }
 0x2e4   :  { %vm2775_vm8 = vmand %vm3145_vm11, %vm638_vm14  ;;  %vm3154_vm11 = vnez %v3133_v0 }
 0x2e5   :  { %1319 = vadd.xlane.f32.xlu0 %v2691_v11  ;;  %vm755_vm10 = vmand %vm739_vm13, %vm2775_vm8  ;;  %vm3153_vm13 = vnez %v3124_v34 }
 0x2e6   :  { %vm2791_vm14 = vmand %vm3142_vm0, %vm640_vm2  ;;  %v2796_v9 = vsel %vm755_vm10, 1.0, %v3127_v38  ;;  %vm3155_vm2 = vnez %v3126_v21  ;;  %vm3156_vm10 = vnez %v3131_v63 }
 0x2e7   :  { %vm757_vm4 = vmand %vm741_vm9, %vm2791_vm14  ;;  %v1642_v0 = vsel %vm3156_vm10, 1.0, %v3127_v38  ;;  %v1220_v28 = vmul.f32 %v2431_v1, %v2796_v9 }
 0x2e8   :  { %v2803_v14 = vsel %vm757_vm4, 1.0, %v3127_v38 }
 0x2e9   :  { %1323 = vadd.xlane.f32.xlu0 %v2711_v20 }
 0x2ea   :  { %1313 = vadd.xlane.f32.xlu1 %v1621_v33  ;;  %v1213_v33 = vmul.f32 %v2661_v35, %v2403_v53 }
 0x2ed   :  { %1327 = vadd.xlane.f32.xlu0 %v2737_v50 }
 0x2ee   :  { %1317 = vadd.xlane.f32.xlu1 %v2743_v22 }
 0x2f1   :  { %1331 = vadd.xlane.f32.xlu0 %v2759_v29 }
 0x2f2   :  { %1321 = vadd.xlane.f32.xlu1 %v2765_v55 }
 0x2f5   :  { %1225 = vadd.xlane.f32.xlu0 %v1208_v31  ;;  %v1209_v31 = vmul.f32 %v2338_v16, %v2386_v46 }
 0x2f6   :  { %1325 = vadd.xlane.f32.xlu1 %v2781_v12 }
 0x2f9   :  { %1229 = vadd.xlane.f32.xlu0 %v1210_v8  ;;  %v1215_v8 = vmul.f32 %v2691_v11, %v2413_v57 }
 0x2fa   :  { %1329 = vadd.xlane.f32.xlu1 %v2796_v9 }
 0x2fd   :  { %1233 = vadd.xlane.f32.xlu0 %v1212_v2 }
 0x2fe   :  { %1333 = vadd.xlane.f32.xlu1 %v2803_v14 }
 0x302   :  { %1223 = vadd.xlane.f32.xlu1 %v1207_v44 }
 0x306   :  { %1227 = vadd.xlane.f32.xlu1 %v1209_v31 }
 0x30a   :  { %1231 = vadd.xlane.f32.xlu1 %v1211_v58 }
 0x30e   :  { %1235 = vadd.xlane.f32.xlu1 %v1213_v33 }
 0x312   :  { %1239 = vadd.xlane.f32.xlu1 %v1215_v8 }
 0x313   :  { %990 = vperm.xlu0 %1831, %v2610_v5  }
 0x31f   :  { %v926_v10 = vpop.permute.xlu1 %925 }
 0x320   :  { %v999_v2 = vsub.f32 %v2374_v40, %v926_v10 }
 0x322   :  { %v1016_v16 = vmul.f32 1.442695, %v999_v2 }
 0x323   :  { %v921_v44 = vpop.permute.xlu1 %920 }
 0x324   :  { %v998_v31 = vsub.f32 %v2379_v42, %v921_v44  ;;  %1833 = vpow2.f32 %v1016_v16  ;;  %v1214_v44 = vmul.f32 %v2401_v52, %v2743_v22  ;;  %v1633_v22 = vsel %vm2290_vm5, 1.0, %v3127_v38 }
 0x325   :  { %vm3150_vm5 = vnez %v3095_v7 }
 0x326   :  { %v1014_v59 = vmul.f32 1.442695, %v998_v31  ;;  %v1635_v13 = vsel %vm3150_vm5, 1.0, %v3127_v38 }
 0x327   :  { %v936_v27 = vpop.permute.xlu1 %935 }
 0x328   :  { %v1001_v58 = vsub.f32 %v2384_v45, %v936_v27  ;;  %1835 = vpow2.f32 %v1014_v59 }
 0x329   :  { %v931_v35 = vpop.permute.xlu0 %930 }
 0x32a   :  { %v1000_v33 = vsub.f32 %v2386_v46, %v931_v35  ;;  %v1020_v11 = vmul.f32 1.442695, %v1001_v58 }
 0x32c   :  { %v1018_v8 = vmul.f32 1.442695, %v1000_v33 }
 0x32d   :  { %v946_v51 = vpop.permute.xlu1 %945  ;;  %v941_v5 = vpop.permute.xlu0 %940 }
 0x32e   :  { %1837 = vpow2.f32 %v1018_v8  ;;  %v1003_v40 = vsub.f32 %v2391_v48, %v946_v51  ;;  %v1002_v10 = vsub.f32 %v2393_v49, %v941_v5  ;;  %v1216_v48 = vmul.f32 %v2411_v56, %v2765_v55 }
 0x32f   :  { %1839 = vpow2.f32 %v1020_v11 }
 0x330   :  { %v1024_v42 = vmul.f32 1.442695, %v1003_v40  ;;  %v1022_v2 = vmul.f32 1.442695, %v1002_v10 }
 0x331   :  { %v956_v45 = vpop.permute.xlu1 %955  ;;  %v951_v16 = vpop.permute.xlu0 %950 }
 0x332   :  { %v1005_v46 = vsub.f32 %v2401_v52, %v956_v45  ;;  %v1004_v59 = vsub.f32 %v2403_v53, %v951_v16  ;;  %1237 = vadd.xlane.f32.xlu0 %v1214_v44  ;;  %1841 = vpow2.f32 %v1022_v2  ;;  %v1834_v49 = vpop.eup %1833  ;;  %v1632_v53 = vsel %vm2296_vm6, 1.0, %v3127_v38 }
 0x333   :  { %1843 = vpow2.f32 %v1024_v42  ;;  %v1079_v11 = vmul.f32 %v1834_v49, %v1633_v22  ;;  %vm3151_vm6 = vnez %v3099_v23  ;;  %v1638_v23 = vsel %vm3153_vm13, 1.0, %v3127_v38 }
 0x334   :  { %v1028_v31 = vmul.f32 1.442695, %v1005_v46  ;;  %v1026_v27 = vmul.f32 1.442695, %v1004_v59 }
 0x335   :  { %v966_v51 = vpop.permute.xlu1 %965  ;;  %v961_v5 = vpop.permute.xlu0 %960 }
 0x336   :  { %v1007_v58 = vsub.f32 %v2411_v56, %v966_v51  ;;  %v1006_v52 = vsub.f32 %v2413_v57, %v961_v5  ;;  %1241 = vadd.xlane.f32.xlu0 %v1216_v48  ;;  %1845 = vpow2.f32 %v1026_v27  ;;  %v1836_v35 = vpop.eup %1835  ;;  %v1636_v27 = vsel %vm3151_vm6, 1.0, %v3127_v38 }
 0x337   :  { %1847 = vpow2.f32 %v1028_v31  ;;  %v1078_v6 = vmul.f32 %v1836_v35, %v1632_v53 }
 0x338   :  { %v1032_v55 = vmul.f32 1.442695, %v1007_v58  ;;  %v1030_v33 = vmul.f32 1.442695, %v1006_v52  ;;  %v1637_v52 = vsel %vm3152_vm15, 1.0, %v3127_v38 }
 0x339   :  { %v976_v8 = vpop.permute.xlu1 %975  ;;  %v971_v40 = vpop.permute.xlu0 %970 }
 0x33a   :  { %v1009_v56 = vsub.f32 %v2421_v61, %v976_v8  ;;  %v1008_v57 = vsub.f32 %v2423_v62, %v971_v40  ;;  %1128 = vadd.xlane.f32.xlu0 %v1079_v11  ;;  %1849 = vpow2.f32 %v1030_v33  ;;  %v1639_v8 = vsel %vm3154_vm11, 1.0, %v3127_v38 }
 0x33b   :  { %v1838_v10 = vpop.eup %1837  ;;  %1851 = vpow2.f32 %v1032_v55  ;;  %v1640_v40 = vsel %vm3155_vm2, 1.0, %v3127_v38 }
 0x33c   :  { %v1036_v42 = vmul.f32 1.442695, %v1009_v56  ;;  %v1034_v2 = vmul.f32 1.442695, %v1008_v57  ;;  %v1080_v44 = vmul.f32 %v1838_v10, %v1634_v3  ;;  %v1840_v45 = vpop.eup %1839  ;;  %v1641_v57 = vsel %vm2732_vm12, 1.0, %v3127_v38 }
 0x33d   :  { %v986_v16 = vpop.permute.xlu1 %985  ;;  %v981_v46 = vpop.permute.xlu0 %980  ;;  %v1081_v5 = vmul.f32 %v1840_v45, %v1635_v13  ;;  %vm3157_vm12 = vcmask 7168  }
 0x33e   :  { %v1011_v59 = vsub.f32 %v2431_v1, %v986_v16  ;;  %v1010_v31 = vsub.f32 %v2433_v4, %v981_v46  ;;  %1126 = vadd.xlane.f32.xlu0 %v1078_v6  ;;  %1130 = vadd.xlane.f32.xlu1 %v1080_v44  ;;  %1853 = vpow2.f32 %v1034_v2  ;;  %v1643_v2 = vsel %vm2754_vm1, 1.0, %v3127_v38  ;;  %vm3158_vm7 = vmmov %vm3157_vm12 }
 0x33f   :  { %v1842_v48 = vpop.eup %1841  ;;  %1855 = vpow2.f32 %v1036_v42  ;;  %v1645_v46 = vsel %vm2775_vm8, 1.0, %v3127_v38  ;;  %vm3159_vm1 = vmmov %vm3158_vm7 }
 0x340   :  { %v1040_v49 = vmul.f32 1.442695, %v1011_v59  ;;  %v1038_v51 = vmul.f32 1.442695, %v1010_v31  ;;  %v1844_v22 = vpop.eup %1843  ;;  %v1082_v7 = vmul.f32 %v1842_v48, %v1636_v27  ;;  %v1647_v31 = vsel %vm2791_vm14, 1.0, %v3127_v38  ;;  %vm3160_vm8 = vmmov %vm3159_vm1 }
 0x341   :  { %v996_v58 = vpop.permute.xlu1 %995  ;;  %v1083_v33 = vmul.f32 %v1844_v22, %v1637_v52  ;;  %v1218_v27 = vmul.f32 %v2421_v61, %v2781_v12  ;;  %v1222_v48 = vmul.f32 %v2442_v17, %v2803_v14  ;;  %v1292_v61 = vld [vmem:[#allocation6 + $0x28] sm:$0xff]  ;;  %vm3161_vm9 = vmmov %vm3159_vm1 }
 0x342   :  { %v1013_v53 = vsub.f32 %v2442_v17, %v996_v58  ;;  %1132 = vadd.xlane.f32.xlu0 %v1081_v5  ;;  %1857 = vpow2.f32 %v1038_v51  ;;  %1134 = vadd.xlane.f32.xlu1 %v1082_v7  ;;  %v1297_v7 = vld [vmem:[#allocation6 + $0x50] sm:$0xff]  ;;  %v1294_v17 = vld [vmem:[#allocation6 + $0x38] sm:$0xff]  ;;  %vm3162_vm0 = vmmov %vm3159_vm1 }
 0x343   :  { %v1846_v35 = vpop.eup %1845  ;;  %1859 = vpow2.f32 %v1040_v49  ;;  %v1293_v49 = vld [vmem:[#allocation6 + $0x30] sm:$0xff]  ;;  %vm3163_vm14 = vmmov %vm3162_vm0 }
 0x344   :  { %v1044_v55 = vmul.f32 1.442695, %v1013_v53  ;;  %v1848_v11 = vpop.eup %1847  ;;  %v1084_v43 = vmul.f32 %v1846_v35, %v1638_v23  ;;  %v1299_v53 = vld [vmem:[#allocation6 + $0x60] sm:$0xff]  ;;  %vm3164_vm4 = vmmov %vm3162_vm0 }
 0x345   :  { %v1085_v3 = vmul.f32 %v1848_v11, %v1639_v8  ;;  %v1296_v11 = vld [vmem:[#allocation6 + $0x48] sm:$0xff]  ;;  %vm3165_vm5 = vmmov %vm3162_vm0 }
 0x346   :  { %1136 = vadd.xlane.f32.xlu0 %v1083_v33  ;;  %1138 = vadd.xlane.f32.xlu1 %v1084_v43  ;;  %1861 = vpow2.f32 %v1044_v55  ;;  %v1301_v33 = vld [vmem:[#allocation6 + $0x70] sm:$0xff]  ;;  %vm3166_vm6 = vmmov %vm3162_vm0 }
 0x347   :  { %v1850_v34 = vpop.eup %1849  ;;  %vm3167_vm15 = vmmov %vm3162_vm0 }
 0x348   :  { %v1852_v56 = vpop.eup %1851  ;;  %v1086_v10 = vmul.f32 %v1850_v34, %v1640_v40  ;;  %vm3168_vm13 = vmmov %vm3162_vm0 }
 0x349   :  { %v1087_v42 = vmul.f32 %v1852_v56, %v1641_v57  ;;  %v1298_v56 = vld [vmem:[#allocation6 + $0x58] sm:$0xff]  ;;  %vm3169_vm11 = vmmov %vm3162_vm0 }
 0x34a   :  { %1140 = vadd.xlane.f32.xlu0 %v1085_v3  ;;  %1142 = vadd.xlane.f32.xlu1 %v1086_v10  ;;  %v1192_v3 = vld [vmem:[#allocation5 + $0x8] sm:$0xff]  ;;  %vm3170_vm2 = vmmov %vm3162_vm0 }
 0x34b   :  { %v1854_v6 = vpop.eup %1853  ;;  %vm3171_vm10 = vmmov %vm3162_vm0 }
 0x34c   :  { %v1856_v21 = vpop.eup %1855  ;;  %v1088_v44 = vmul.f32 %v1854_v6, %v1642_v0 }
 0x34d   :  { %v1089_v16 = vmul.f32 %v1856_v21, %v1643_v2  ;;  %v1300_v21 = vld [vmem:[#allocation6 + $0x68] sm:$0xff] }
 0x34e   :  { %1144 = vadd.xlane.f32.xlu0 %v1087_v42  ;;  %1146 = vadd.xlane.f32.xlu1 %v1088_v44  ;;  %v1194_v42 = vld [vmem:[#allocation5 + $0x18] sm:$0xff] }
 0x34f   :  { %v1858_v45 = vpop.eup %1857 }
 0x350   :  { %v1860_v63 = vpop.eup %1859  ;;  %v1090_v13 = vmul.f32 %v1858_v45, %v1644_v47 }
 0x351   :  { %v1091_v59 = vmul.f32 %v1860_v63, %v1645_v46  ;;  %v1302_v63 = vld [vmem:[#allocation6 + $0x78] sm:$0xff] }
 0x352   :  { %1148 = vadd.xlane.f32.xlu0 %v1089_v16  ;;  %1150 = vadd.xlane.f32.xlu1 %v1090_v13  ;;  %v1196_v16 = vld [vmem:[#allocation5 + $0x28] sm:$0xff] }
 0x353   :  { %v1862_v30 = vpop.eup %1861 }
 0x354   :  { %v1093_v26 = vmul.f32 %v1862_v30, %v1647_v31  ;;  %v1191_v31 = vld [vmem:[#allocation5] sm:$0xff] }
 0x356   :  { %1152 = vadd.xlane.f32.xlu0 %v1091_v59 }
 0x35a   :  { %1156 = vadd.xlane.f32.xlu0 %v1093_v26 }
 0x35e   :  { %1245 = vadd.xlane.f32.xlu0 %v1218_v27 }
 0x362   :  { %1249 = vadd.xlane.f32.xlu0 %v1220_v28  ;;  %v1193_v28 = vld [vmem:[#allocation5 + $0x10] sm:$0xff] }
 0x366   :  { %1253 = vadd.xlane.f32.xlu0 %v1222_v48 }
 0x36a   :  { %v1316_v51 = vpop.xlane.xlu0 %1315 }
 0x36b   :  { %v1341_v5 = vadd.f32 %v1316_v51, %v1293_v49 }
 0x36d   :  { %1357 = vst.msk [vmem:[#allocation6 + $0x30] sm:$0xff] %vm3157_vm12, %v1341_v5  ;;  %vm3172_vm12 = vmmov %vm3162_vm0 }
 0x36e   :  { %v1320_v22 = vpop.xlane.xlu0 %1319 }
 0x36f   :  { %v1343_v58 = vadd.f32 %v1320_v22, %v1295_v60  ;;  %v1195_v22 = vld [vmem:[#allocation5 + $0x20] sm:$0xff] }
 0x371   :  { %1359 = vst.msk [vmem:[#allocation6 + $0x40] sm:$0xff] %vm3158_vm7, %v1343_v58  ;;  %vm3173_vm7 = vmmov %vm3162_vm0 }
 0x372   :  { %v1324_v12 = vpop.xlane.xlu0 %1323 }
 0x373   :  { %v1345_v52 = vadd.f32 %v1324_v12, %v1297_v7  ;;  %v1314_v1 = vpop.xlane.xlu1 %1313 }
 0x374   :  { %v1340_v9 = vadd.f32 %v1314_v1, %v1292_v61  ;;  %v1197_v61 = vld [vmem:[#allocation5 + $0x30] sm:$0xff]  ;;  %v1199_v1 = vld [vmem:[#allocation5 + $0x40] sm:$0xff] }
 0x375   :  { %1361 = vst.msk [vmem:[#allocation6 + $0x50] sm:$0xff] %vm3159_vm1, %v1345_v52  ;;  %vm3174_vm1 = vmmov %vm3162_vm0 }
 0x376   :  { %1356 = vst.msk [vmem:[#allocation6 + $0x28] sm:$0xff] %vm3160_vm8, %v1340_v9  ;;  %v1328_v14 = vpop.xlane.xlu0 %1327  ;;  %vm3175_vm8 = vmmov %vm3162_vm0 }
 0x377   :  { %v1347_v23 = vadd.f32 %v1328_v14, %v1299_v53  ;;  %v1318_v35 = vpop.xlane.xlu1 %1317 }
 0x378   :  { %v1342_v55 = vadd.f32 %v1318_v35, %v1294_v17  ;;  %v1646_v17 = vsel %vm2724_vm3, 1.0, %v3127_v38  ;;  %v1217_v35 = vmul.f32 %v2711_v20, %v2423_v62  ;;  %v888_v38 = vmul.f32 1.442695, %v3176_v24  ;;  %vm3191_vm3 = vmmov %vm3162_vm0 }
 0x379   :  { %1363 = vst.msk [vmem:[#allocation6 + $0x60] sm:$0xff] %vm3161_vm9, %v1347_v23  ;;  %v3178_v62 = vsub.f32 %v2503_v41, %v2513_v54  ;;  %v3186_v41 = vld [vmem:[#allocation13_spill] sm:$0xff]  ;;  %vm3198_vm9 = vmmov %vm3162_vm0 }
 0x37a   :  { %1358 = vst.msk [vmem:[#allocation6 + $0x38] sm:$0xff] %vm3162_vm0, %v1342_v55  ;;  %v1332_v8 = vpop.xlane.xlu0 %1331  ;;  %v1219_v55 = vmul.f32 %v2737_v50, %v2433_v4  ;;  %v3179_v4 = vsub.f32 %v2491_v18, %v2498_v25  ;;  %v1200_v18 = vld [vmem:[#allocation5 + $0x48] sm:$0xff]  ;;  %v3188_v25 = vld [vmem:[#allocation16_spill] sm:$0xff] }
 0x37b   :  { %v1349_v43 = vadd.f32 %v1332_v8, %v1301_v33  ;;  %v1322_v40 = vpop.xlane.xlu1 %1321  ;;  %v1221_v33 = vmul.f32 %v2759_v29, %v2444_v19  ;;  %v890_v20 = vmul.f32 1.442695, %v3178_v62  ;;  %v1198_v29 = vld [vmem:[#allocation5 + $0x38] sm:$0xff] }
 0x37c   :  { %v1344_v34 = vadd.f32 %v1322_v40, %v1296_v11  ;;  %v3177_v11 = vsub.f32 %v2478_v36, %v2488_v15  ;;  %v892_v50 = vmul.f32 1.442695, %v3179_v4  ;;  %v3183_v36 = vld [vmem:[#allocation14_spill] sm:$0xff]  ;;  %v1404_v4 = vld [vmem:[#allocation6 + $0x10] sm:$0xff] }
 0x37d   :  { %1365 = vst.msk [vmem:[#allocation6 + $0x70] sm:$0xff] %vm3163_vm14, %v1349_v43  ;;  %v3182_v43 = vld [vmem:[#allocation12_spill] sm:$0xff]  ;;  %vm3211_vm14 = vmmov %vm3162_vm0 }
 0x37e   :  { %1360 = vst.msk [vmem:[#allocation6 + $0x48] sm:$0xff] %vm3164_vm4, %v1344_v34  ;;  %v1226_v57 = vpop.xlane.xlu0 %1225  ;;  %v886_v8 = vmul.f32 1.442695, %v3177_v11  ;;  %v3184_v15 = vsub.f32 %v3182_v43, %v3183_v36  ;;  %v3185_v34 = vld [vmem:[#allocation11_spill] sm:$0xff]  ;;  %vm3212_vm4 = vmmov %vm3162_vm0 }
 0x37f   :  { %v1256_v10 = vadd.f32 %v1226_v57, %v1192_v3  ;;  %v1326_v0 = vpop.xlane.xlu1 %1325  ;;  %v3187_v54 = vsub.f32 %v3185_v34, %v3186_v41  ;;  %v1405_v41 = vld [vmem:[#allocation6 + $0x18] sm:$0xff] }
 0x380   :  { %v1346_v6 = vadd.f32 %v1326_v0, %v1298_v56  ;;  %v896_v40 = vmul.f32 1.442695, %v3184_v15 }
 0x381   :  { %1272 = vst.msk [vmem:[#allocation5 + $0x8] sm:$0xff] %vm3165_vm5, %v1256_v10  ;;  %v898_v3 = vmul.f32 1.442695, %v3187_v54  ;;  %v3189_v10 = vld [vmem:[#allocation18_spill] sm:$0xff]  ;;  %v3213_v54 = vld [vmem:[#allocation31_spill] sm:$0xff]  ;;  %vm3216_vm5 = vmmov %vm3162_vm0 }
 0x382   :  { %1362 = vst.msk [vmem:[#allocation6 + $0x58] sm:$0xff] %vm3166_vm6, %v1346_v6  ;;  %v1230_v2 = vpop.xlane.xlu0 %1229  ;;  %v3190_v0 = vsub.f32 %v3188_v25, %v3189_v10  ;;  %v1100_v10 = vld [vmem:[#allocation4 + $0x30] sm:$0xff]  ;;  %vm3217_vm6 = vmmov %vm3162_vm0 }
 0x383   :  { %v1258_v44 = vadd.f32 %v1230_v2, %v1194_v42  ;;  %v1330_v47 = vpop.xlane.xlu1 %1329  ;;  %v3192_v42 = vld [vmem:[#allocation15_spill] sm:$0xff] }
 0x384   :  { %v1348_v45 = vadd.f32 %v1330_v47, %v1300_v21  ;;  %v3193_v21 = vld [vmem:[#allocation17_spill] sm:$0xff] }
 0x385   :  { %1274 = vst.msk [vmem:[#allocation5 + $0x18] sm:$0xff] %vm3167_vm15, %v1258_v44  ;;  %v3194_v2 = vsub.f32 %v3192_v42, %v3193_v21  ;;  %vm3218_vm15 = vmmov %vm3162_vm0 }
 0x386   :  { %1364 = vst.msk [vmem:[#allocation6 + $0x68] sm:$0xff] %vm3168_vm13, %v1348_v45  ;;  %v1234_v46 = vpop.xlane.xlu0 %1233  ;;  %v1095_v45 = vld [vmem:[#allocation4 + $0x8] sm:$0xff]  ;;  %vm3219_vm13 = vmmov %vm3162_vm0 }
 0x387   :  { %v1260_v13 = vadd.f32 %v1234_v46, %v1196_v16  ;;  %v1334_v59 = vpop.xlane.xlu1 %1333  ;;  %v902_v44 = vmul.f32 1.442695, %v3194_v2  ;;  %v3195_v46 = vld [vmem:[#allocation20_spill] sm:$0xff] }
 0x388   :  { %v1350_v30 = vadd.f32 %v1334_v59, %v1302_v63 }
 0x389   :  { %1276 = vst.msk [vmem:[#allocation5 + $0x28] sm:$0xff] %vm3169_vm11, %v1260_v13  ;;  %v3196_v13 = vld [vmem:[#allocation22_spill] sm:$0xff]  ;;  %vm3220_vm11 = vmmov %vm3162_vm0 }
 0x38a   :  { %1366 = vst.msk [vmem:[#allocation6 + $0x78] sm:$0xff] %vm3170_vm2, %v1350_v30  ;;  %v3197_v59 = vsub.f32 %v3195_v46, %v3196_v13  ;;  %v1102_v46 = vld [vmem:[#allocation4 + $0x40] sm:$0xff]  ;;  %v1408_v13 = vld [vmem:[#allocation6 + $0x30] sm:$0xff]  ;;  %vm3221_vm2 = vmmov %vm3162_vm0 }
 0x38b   :  { %v1224_v26 = vpop.xlane.xlu1 %1223 }
 0x38c   :  { %v1255_v27 = vadd.f32 %v1224_v26, %v1191_v31  ;;  %v904_v30 = vmul.f32 1.442695, %v3197_v59 }
 0x38e   :  { %1271 = vst.msk [vmem:[#allocation5] sm:$0xff] %vm3171_vm10, %v1255_v27  ;;  %v991_v48 = vpop.permute.xlu0 %990  ;;  %v3199_v27 = vld [vmem:[#allocation19_spill] sm:$0xff]  ;;  %vm3222_vm10 = vmmov %vm3162_vm0 }
 0x38f   :  { %v1012_v49 = vsub.f32 %v2444_v19, %v991_v48  ;;  %v1228_v51 = vpop.xlane.xlu1 %1227  ;;  %v3180_v19 = vld [vmem:[#allocation10_spill] sm:$0xff] }
 0x390   :  { %v1257_v5 = vadd.f32 %v1228_v51, %v1193_v28  ;;  %v3181_v32 = vsub.f32 %v2501_v39, %v3180_v19  ;;  %v900_v39 = vmul.f32 1.442695, %v3190_v0  ;;  %v3200_v28 = vld [vmem:[#allocation21_spill] sm:$0xff]  ;;  %v3209_v19 = vld [vmem:[#allocation30_spill] sm:$0xff] }
 0x391   :  { %v1042_v60 = vmul.f32 1.442695, %v1012_v49  ;;  %v3201_v48 = vsub.f32 %v3199_v27, %v3200_v28 }
 0x392   :  { %1273 = vst.msk [vmem:[#allocation5 + $0x10] sm:$0xff] %vm3172_vm12, %v1257_v5  ;;  %v894_v37 = vmul.f32 1.442695, %v3181_v32  ;;  %v1096_v5 = vld [vmem:[#allocation4 + $0x10] sm:$0xff]  ;;  %vm3223_vm12 = vmmov %vm3162_vm0 }
 0x393   :  { %1863 = vpow2.f32 %v1042_v60  ;;  %v1232_v58 = vpop.xlane.xlu1 %1231  ;;  %v906_v49 = vmul.f32 1.442695, %v3201_v48  ;;  %v1094_v60 = vld [vmem:[#allocation4] sm:$0xff] }
 0x394   :  { %v1259_v7 = vadd.f32 %v1232_v58, %v1195_v22  ;;  %1865 = vpow2.f32 %v888_v38  ;;  %v1403_v58 = vld [vmem:[#allocation6 + $0x8] sm:$0xff]  ;;  %v1097_v38 = vld [vmem:[#allocation4 + $0x18] sm:$0xff] }
 0x395   :  { %1867 = vpow2.f32 %v886_v8 }
 0x396   :  { %1275 = vst.msk [vmem:[#allocation5 + $0x20] sm:$0xff] %vm3173_vm7, %v1259_v7  ;;  %1869 = vpow2.f32 %v890_v20  ;;  %v1402_v7 = vld [vmem:[#allocation6] sm:$0xff]  ;;  %vm3224_vm7 = vmmov %vm3162_vm0 }
 0x397   :  { %v1236_v12 = vpop.xlane.xlu1 %1235  ;;  %1871 = vpow2.f32 %v892_v50  ;;  %v1098_v20 = vld [vmem:[#allocation4 + $0x20] sm:$0xff]  ;;  %v3208_v50 = vld [vmem:[#allocation28_spill] sm:$0xff] }
 0x398   :  { %v1261_v52 = vadd.f32 %v1236_v12, %v1197_v61  ;;  %1873 = vpow2.f32 %v894_v37  ;;  %v3202_v61 = vld [vmem:[#allocation24_spill] sm:$0xff]  ;;  %v3203_v12 = vld [vmem:[#allocation26_spill] sm:$0xff]  ;;  %v3210_v32 = vsub.f32 %v3208_v50, %v3209_v19 }
 0x399   :  { %1875 = vpow2.f32 %v896_v40  ;;  %v1099_v40 = vld [vmem:[#allocation4 + $0x28] sm:$0xff] }
 0x39a   :  { %1277 = vst.msk [vmem:[#allocation5 + $0x30] sm:$0xff] %vm3174_vm1, %v1261_v52  ;;  %1877 = vpow2.f32 %v898_v3  ;;  %v3204_v52 = vsub.f32 %v3202_v61, %v3203_v12  ;;  %v912_v37 = vmul.f32 1.442695, %v3210_v32  ;;  %v3214_v3 = vld [vmem:[#allocation32_spill] sm:$0xff]  ;;  %v1410_v61 = vld [vmem:[#allocation6 + $0x40] sm:$0xff]  ;;  %v1387_v12 = vld [vmem:[#allocation5 + $0x8] sm:$0xff] }
 0x39b   :  { %v1240_v9 = vpop.xlane.xlu1 %1239  ;;  %1879 = vpow2.f32 %v900_v39  ;;  %vm3225_vm1 = vmmov %vm3162_vm0 }
 0x39c   :  { %v1263_v53 = vadd.f32 %v1240_v9, %v1199_v1  ;;  %1881 = vpow2.f32 %v902_v44  ;;  %v908_v1 = vmul.f32 1.442695, %v3204_v52 }
 0x39d   :  { %1883 = vpow2.f32 %v904_v30 }
 0x39e   :  { %1279 = vst.msk [vmem:[#allocation5 + $0x40] sm:$0xff] %vm3175_vm8, %v1263_v53  ;;  %1885 = vpow2.f32 %v906_v49  ;;  %vm3226_vm8 = vmmov %vm3162_vm0 }
 0x39f   :  { %1887 = vrcp.f32 %v1403_v58  ;;  %v1104_v58 = vld [vmem:[#allocation4 + $0x50] sm:$0xff] }
 0x3a0   :  { %v1864_v14 = vpop.eup %1863  ;;  %1889 = vrcp.f32 %v1402_v7 }
 0x3a1   :  { %v1092_v23 = vmul.f32 %v1864_v14, %v1646_v17  ;;  %v1866_v6 = vpop.eup %1865  ;;  %v3205_v14 = vld [vmem:[#allocation23_spill] sm:$0xff]  ;;  %1891 = vpow2.f32 %v908_v1 }
 0x3a2   :  { %v1868_v63 = vpop.eup %1867  ;;  %v1111_v31 = vmul.f32 %v1866_v6, %v1095_v45  ;;  %v1406_v6 = vld [vmem:[#allocation6 + $0x20] sm:$0xff] }
 0x3a3   :  { %1154 = vadd.xlane.f32.xlu1 %v1092_v23  ;;  %v1870_v26 = vpop.eup %1869  ;;  %v1110_v53 = vmul.f32 %v1868_v63, %v1094_v60  ;;  %v3206_v23 = vld [vmem:[#allocation25_spill] sm:$0xff] }
 0x3a4   :  { %v1112_v9 = vmul.f32 %v1870_v26, %v1096_v5  ;;  %v1872_v17 = vpop.eup %1871  ;;  %v1407_v26 = vld [vmem:[#allocation6 + $0x28] sm:$0xff] }
 0x3a5   :  { %v1874_v11 = vpop.eup %1873 }
 0x3a6   :  { %v1876_v43 = vpop.eup %1875  ;;  %v1114_v36 = vmul.f32 %v1874_v11, %v1098_v20 }
 0x3a7   :  { %1243 = vadd.xlane.f32.xlu1 %v1217_v35  ;;  %v3207_v35 = vsub.f32 %v3205_v14, %v3206_v23  ;;  %v1878_v34 = vpop.eup %1877  ;;  %v1115_v42 = vmul.f32 %v1876_v43, %v1099_v40  ;;  %v1451_v40 = vld [vmem:[#allocation3 + $0x8] sm:$0xff] }
 0x3a8   :  { %v1880_v21 = vpop.eup %1879  ;;  %v1116_v2 = vmul.f32 %v1878_v34, %v1100_v10 }
 0x3a9   :  { %v1882_v45 = vpop.eup %1881 }
 0x3aa   :  { %v1884_v28 = vpop.eup %1883  ;;  %v1118_v48 = vmul.f32 %v1882_v45, %v1102_v46  ;;  %v1452_v46 = vld [vmem:[#allocation3 + $0x10] sm:$0xff] }
 0x3ab   :  { %1247 = vadd.xlane.f32.xlu1 %v1219_v55  ;;  %v910_v55 = vmul.f32 1.442695, %v3207_v35  ;;  %v1886_v5 = vpop.eup %1885 }
 0x3ac   :  { %v1888_v7 = vpop.eup %1887  ;;  %v1120_v35 = vmul.f32 %v1886_v5, %v1104_v58 }
 0x3ad   :  { %1893 = vpow2.f32 %v910_v55 }
 0x3ae   :  { %1895 = vrcp.f32 %v1404_v4  ;;  %v1388_v4 = vld [vmem:[#allocation5 + $0x10] sm:$0xff] }
 0x3af   :  { %1251 = vadd.xlane.f32.xlu1 %v1221_v33  ;;  %1897 = vpow2.f32 %v912_v37  ;;  %v1411_v37 = vld [vmem:[#allocation6 + $0x48] sm:$0xff] }
 0x3bb   :  { %v1238_v56 = vpop.xlane.xlu0 %1237 }
 0x3bc   :  { %v1262_v57 = vadd.f32 %v1238_v56, %v1198_v29  ;;  %v1113_v29 = vmul.f32 %v1872_v17, %v1097_v38  ;;  %v3215_v56 = vsub.f32 %v3213_v54, %v3214_v3  ;;  %v1421_v38 = vmul.f32 %v1888_v7, %v1387_v12  ;;  %v1107_v54 = vld [vmem:[#allocation4 + $0x68] sm:$0xff] }
 0x3be   :  { %1278 = vst.msk [vmem:[#allocation5 + $0x38] sm:$0xff] %vm3191_vm3, %v1262_v57  ;;  %v916_v57 = vmul.f32 1.442695, %v3215_v56  ;;  %v1467_v56 = vsub.f32 %v1421_v38, %v1451_v40  ;;  %vm3227_vm3 = vmmov %vm3162_vm0 }
 0x3bf   :  { %v1242_v47 = vpop.xlane.xlu0 %1241 }
 0x3c0   :  { %v1264_v16 = vadd.f32 %v1242_v47, %v1200_v18  ;;  %v1101_v47 = vld [vmem:[#allocation4 + $0x38] sm:$0xff] }
 0x3c1   :  { %v1117_v27 = vmul.f32 %v1880_v21, %v1101_v47 }
 0x3c2   :  { %1280 = vst.msk [vmem:[#allocation5 + $0x48] sm:$0xff] %vm3198_vm9, %v1264_v16  ;;  %vm3228_vm9 = vmmov %vm3162_vm0 }
 0x3c3   :  { %v1129_v51 = vpop.xlane.xlu0 %1128 }
 0x3c4   :  { %v1159_v22 = vadd.f32 %v1129_v51, %v1111_v31  ;;  %v1103_v51 = vld [vmem:[#allocation4 + $0x48] sm:$0xff] }
 0x3c5   :  { %v1119_v14 = vmul.f32 %v1884_v28, %v1103_v51 }
 0x3c6   :  { %1176 = vst.msk [vmem:[#allocation4 + $0x8] sm:$0xff] %vm3162_vm0, %v1159_v22 }
 0x3c7   :  { %v1131_v33 = vpop.xlane.xlu1 %1130  ;;  %v1127_v24 = vpop.xlane.xlu0 %1126 }
 0x3c8   :  { %v1160_v8 = vadd.f32 %v1131_v33, %v1112_v9  ;;  %v1158_v62 = vadd.f32 %v1127_v24, %v1110_v53  ;;  %v1890_v9 = vpop.eup %1889  ;;  %v1409_v53 = vld [vmem:[#allocation6 + $0x38] sm:$0xff] }
 0x3c9   :  { %v1892_v23 = vpop.eup %1891  ;;  %v1105_v33 = vld [vmem:[#allocation4 + $0x58] sm:$0xff] }
 0x3ca   :  { %1177 = vst.msk [vmem:[#allocation4 + $0x10] sm:$0xff] %vm3211_vm14, %v1160_v8  ;;  %v1894_v24 = vpop.eup %1893  ;;  %vm3229_vm14 = vmmov %vm3162_vm0 }
 0x3cb   :  { %1175 = vst.msk [vmem:[#allocation4] sm:$0xff] %vm3212_vm4, %v1158_v62  ;;  %v1133_v15 = vpop.xlane.xlu0 %1132  ;;  %v1135_v18 = vpop.xlane.xlu1 %1134  ;;  %v1106_v62 = vld [vmem:[#allocation4 + $0x60] sm:$0xff]  ;;  %vm3230_vm4 = vmmov %vm3162_vm0 }
 0x3cc   :  { %v1161_v25 = vadd.f32 %v1133_v15, %v1113_v29  ;;  %v1162_v39 = vadd.f32 %v1135_v18, %v1114_v36  ;;  %v1896_v20 = vpop.eup %1895  ;;  %v1386_v29 = vld [vmem:[#allocation5] sm:$0xff]  ;;  %v1121_v36 = vmul.f32 %v1892_v23, %v1105_v33  ;;  %v1122_v34 = vmul.f32 %v1894_v24, %v1106_v62  ;;  %v1415_v24 = vld [vmem:[#allocation6 + $0x68] sm:$0xff] }
 0x3cd   :  { %v1483_v0 = vld [vmem:[#allocation4 + $0x8] sm:$0xff]  ;;  %v1898_v32 = vpop.eup %1897  ;;  %v1423_v18 = vmul.f32 %v1896_v20, %v1388_v4  ;;  %v1454_v33 = vld [vmem:[#allocation3 + $0x20] sm:$0xff] }
 0x3ce   :  { %1899 = vlog2.f32 %v1483_v0  ;;  %1178 = vst.msk [vmem:[#allocation4 + $0x18] sm:$0xff] %vm3216_vm5, %v1161_v25  ;;  %vm3231_vm5 = vmmov %vm3162_vm0 }
 0x3cf   :  { %1901 = vrcp.f32 %v1405_v41  ;;  %1179 = vst.msk [vmem:[#allocation4 + $0x20] sm:$0xff] %vm3217_vm6, %v1162_v39  ;;  %v1137_v44 = vpop.xlane.xlu0 %1136  ;;  %v1139_v16 = vpop.xlane.xlu1 %1138  ;;  %v1468_v28 = vsub.f32 %v1423_v18, %v1452_v46  ;;  %v1456_v18 = vld [vmem:[#allocation3 + $0x30] sm:$0xff]  ;;  %v1457_v46 = vld [vmem:[#allocation3 + $0x38] sm:$0xff]  ;;  %vm3232_vm6 = vmmov %vm3162_vm0 }
 0x3d0   :  { %1903 = vpow2.f32 %v916_v57  ;;  %v1163_v63 = vadd.f32 %v1137_v44, %v1115_v42  ;;  %v1164_v31 = vadd.f32 %v1139_v16, %v1116_v2  ;;  %v1389_v57 = vld [vmem:[#allocation5 + $0x18] sm:$0xff]  ;;  %v1390_v44 = vld [vmem:[#allocation5 + $0x20] sm:$0xff]  ;;  %v1123_v16 = vmul.f32 %v1898_v32, %v1107_v54 }
 0x3d1   :  { %1905 = vrcp.f32 %v1406_v6  ;;  %v1484_v59 = vld [vmem:[#allocation4 + $0x10] sm:$0xff]  ;;  %v1419_v6 = vmul.f32 %v1890_v9, %v1386_v29 }
 0x3d2   :  { %v1482_v30 = vld [vmem:[#allocation4] sm:$0xff]  ;;  %1907 = vlog2.f32 %v1484_v59  ;;  %1180 = vst.msk [vmem:[#allocation4 + $0x28] sm:$0xff] %vm3218_vm15, %v1163_v63  ;;  %vm3233_vm15 = vmmov %vm3162_vm0 }
 0x3d3   :  { %1909 = vlog2.f32 %v1482_v30  ;;  %1181 = vst.msk [vmem:[#allocation4 + $0x30] sm:$0xff] %vm3219_vm13, %v1164_v31  ;;  %v1141_v49 = vpop.xlane.xlu0 %1140  ;;  %v1143_v60 = vpop.xlane.xlu1 %1142  ;;  %v1109_v30 = vld [vmem:[#allocation4 + $0x78] sm:$0xff]  ;;  %vm3234_vm13 = vmmov %vm3162_vm0 }
 0x3d4   :  { %1911 = vrcp.f32 %v1408_v13  ;;  %v1165_v22 = vadd.f32 %v1141_v49, %v1117_v27  ;;  %v1166_v1 = vadd.f32 %v1143_v60, %v1118_v48  ;;  %v1413_v27 = vld [vmem:[#allocation6 + $0x58] sm:$0xff]  ;;  %v1391_v60 = vld [vmem:[#allocation5 + $0x28] sm:$0xff] }
 0x3d5   :  { %1913 = vrcp.f32 %v1407_v26  ;;  %v1485_v52 = vld [vmem:[#allocation4 + $0x18] sm:$0xff]  ;;  %v1450_v26 = vld [vmem:[#allocation3] sm:$0xff] }
 0x3d6   :  { %v1486_v17 = vld [vmem:[#allocation4 + $0x20] sm:$0xff]  ;;  %1915 = vlog2.f32 %v1485_v52  ;;  %1182 = vst.msk [vmem:[#allocation4 + $0x38] sm:$0xff] %vm3220_vm11, %v1165_v22  ;;  %v1466_v22 = vsub.f32 %v1419_v6, %v1450_v26  ;;  %v1453_v52 = vld [vmem:[#allocation3 + $0x18] sm:$0xff]  ;;  %vm3235_vm11 = vmmov %vm3162_vm0 }
 0x3d7   :  { %1917 = vlog2.f32 %v1486_v17  ;;  %1183 = vst.msk [vmem:[#allocation4 + $0x40] sm:$0xff] %vm3221_vm2, %v1166_v1  ;;  %v1145_v55 = vpop.xlane.xlu0 %1144  ;;  %v1147_v11 = vpop.xlane.xlu1 %1146  ;;  %v1392_v1 = vld [vmem:[#allocation5 + $0x30] sm:$0xff]  ;;  %vm3236_vm2 = vmmov %vm3162_vm0 }
 0x3d8   :  { %1919 = vrcp.f32 %v1410_v61  ;;  %v1167_v8 = vadd.f32 %v1145_v55, %v1119_v14  ;;  %v1168_v19 = vadd.f32 %v1147_v11, %v1120_v35  ;;  %v1393_v11 = vld [vmem:[#allocation5 + $0x38] sm:$0xff] }
 0x3d9   :  { %1921 = vrcp.f32 %v1409_v53  ;;  %v1487_v50 = vld [vmem:[#allocation4 + $0x28] sm:$0xff] }
 0x3da   :  { %v1488_v43 = vld [vmem:[#allocation4 + $0x30] sm:$0xff]  ;;  %1923 = vlog2.f32 %v1487_v50  ;;  %1184 = vst.msk [vmem:[#allocation4 + $0x48] sm:$0xff] %vm3222_vm10, %v1167_v8  ;;  %vm3237_vm10 = vmmov %vm3162_vm0 }
 0x3db   :  { %v1900_v15 = vpop.eup %1899  ;;  %1925 = vlog2.f32 %v1488_v43  ;;  %1185 = vst.msk [vmem:[#allocation4 + $0x50] sm:$0xff] %vm3223_vm12, %v1168_v19  ;;  %v1149_v41 = vpop.xlane.xlu0 %1148  ;;  %v1202_v43 = vld [vmem:[#allocation5 + $0x58] sm:$0xff]  ;;  %vm3238_vm12 = vmmov %vm3162_vm0 }
 0x3dc   :  { %v1902_v3 = vpop.eup %1901  ;;  %v1501_v25 = vmul.f32 0.6931472, %v1900_v15  ;;  %v1151_v10 = vpop.xlane.xlu1 %1150  ;;  %v1169_v0 = vadd.f32 %v1149_v41, %v1121_v36  ;;  %1927 = vrcp.f32 %v1411_v37  ;;  %v1394_v15 = vld [vmem:[#allocation5 + $0x40] sm:$0xff]  ;;  %v1455_v41 = vld [vmem:[#allocation3 + $0x28] sm:$0xff] }
 0x3dd   :  { %v1904_v39 = vpop.eup %1903  ;;  %v1489_v42 = vld [vmem:[#allocation4 + $0x38] sm:$0xff]  ;;  %v1170_v21 = vadd.f32 %v1151_v10, %v1122_v34  ;;  %v1425_v13 = vmul.f32 %v1902_v3, %v1389_v57 }
 0x3de   :  { %v1906_v2 = vpop.eup %1905  ;;  %v1531_v47 = vsub.f32 %v1467_v56, %v1501_v25  ;;  %v1490_v45 = vld [vmem:[#allocation4 + $0x40] sm:$0xff]  ;;  %1929 = vlog2.f32 %v1489_v42  ;;  %1186 = vst.msk [vmem:[#allocation4 + $0x58] sm:$0xff] %vm3224_vm7, %v1169_v0  ;;  %v1125_v53 = vmul.f32 %v1904_v39, %v1109_v30  ;;  %v1417_v10 = vld [vmem:[#allocation6 + $0x78] sm:$0xff]  ;;  %vm3239_vm7 = vmmov %vm3162_vm0 }
 0x3df   :  { %v1908_v63 = vpop.eup %1907  ;;  %1931 = vlog2.f32 %v1490_v45  ;;  %1187 = vst.msk [vmem:[#allocation4 + $0x60] sm:$0xff] %vm3225_vm1, %v1170_v21  ;;  %v1153_v59 = vpop.xlane.xlu0 %1152  ;;  %v1427_v58 = vmul.f32 %v1906_v2, %v1390_v44  ;;  %v1469_v14 = vsub.f32 %v1425_v13, %v1453_v52  ;;  %v1395_v2 = vld [vmem:[#allocation5 + $0x48] sm:$0xff]  ;;  %vm3240_vm1 = vmmov %vm3162_vm0 }
 0x3e0   :  { %v1910_v31 = vpop.eup %1909  ;;  %v1547_v48 = vmul.f32 -1.0, %v1531_v47  ;;  %v1503_v49 = vmul.f32 0.6931472, %v1908_v63  ;;  %v1171_v51 = vadd.f32 %v1153_v59, %v1123_v16  ;;  %v1204_v16 = vld [vmem:[#allocation5 + $0x68] sm:$0xff] }
 0x3e1   :  { %v1912_v5 = vpop.eup %1911  ;;  %v1499_v7 = vmul.f32 0.6931472, %v1910_v31  ;;  %v1491_v61 = vld [vmem:[#allocation4 + $0x48] sm:$0xff]  ;;  %v1470_v50 = vsub.f32 %v1427_v58, %v1454_v33 }
 0x3e2   :  { %v1914_v12 = vpop.eup %1913  ;;  %1563 = vst.msk [vmem:[%s3055_s4 + $0x8] sm:$0xff] %vm3226_vm8, %v1547_v48  ;;  %v1532_v9 = vsub.f32 %v1468_v28, %v1503_v49  ;;  %1933 = vlog2.f32 %v1491_v61  ;;  %v1431_v19 = vmul.f32 %v1912_v5, %v1392_v1  ;;  %v1458_v28 = vld [vmem:[#allocation3 + $0x40] sm:$0xff]  ;;  %v1206_v61 = vld [vmem:[#allocation5 + $0x78] sm:$0xff]  ;;  %v1459_v1 = vld [vmem:[#allocation3 + $0x48] sm:$0xff] }
 0x3e3   :  { %1188 = vst.msk [vmem:[#allocation4 + $0x68] sm:$0xff] %vm3227_vm3, %v1171_v51  ;;  %v1916_v17 = vpop.eup %1915  ;;  %1935 = vrcp.f32 %v1413_v27  ;;  %v1530_v23 = vsub.f32 %v1466_v22, %v1499_v7  ;;  %v1157_v35 = vpop.xlane.xlu0 %1156  ;;  %v1429_v38 = vmul.f32 %v1914_v12, %v1391_v60  ;;  %vm3241_vm8 = vmmov %vm3162_vm0 }
 0x3e4   :  { %v1918_v55 = vpop.eup %1917  ;;  %v1548_v8 = vmul.f32 -1.0, %v1532_v9  ;;  %v1505_v62 = vmul.f32 0.6931472, %v1916_v17  ;;  %v1173_v20 = vadd.f32 %v1157_v35, %v1125_v53  ;;  %v1472_v42 = vsub.f32 %v1431_v19, %v1456_v18  ;;  %v1465_v18 = vld [vmem:[#allocation3 + $0x78] sm:$0xff]  ;;  %vm3242_vm3 = vmmov %vm3162_vm0 }
 0x3e5   :  { %v1920_v4 = vpop.eup %1919  ;;  %v1546_v32 = vmul.f32 -1.0, %v1530_v23  ;;  %v1507_v37 = vmul.f32 0.6931472, %v1918_v55  ;;  %v1493_v29 = vld [vmem:[#allocation4 + $0x58] sm:$0xff]  ;;  %v1471_v25 = vsub.f32 %v1429_v38, %v1455_v41 }
 0x3e6   :  { %v1922_v36 = vpop.eup %1921  ;;  %1564 = vst.msk [vmem:[%s3055_s4 + $0x10] sm:$0xff] %vm3228_vm9, %v1548_v8  ;;  %v1533_v40 = vsub.f32 %v1469_v14, %v1505_v62  ;;  %1937 = vlog2.f32 %v1493_v29  ;;  %v1435_v21 = vmul.f32 %v1920_v4, %v1394_v15  ;;  %v1461_v62 = vld [vmem:[#allocation3 + $0x58] sm:$0xff]  ;;  %vm3245_vm9 = vmmov %vm3162_vm0 }
 0x3e7   :  { %1190 = vst.msk [vmem:[#allocation4 + $0x78] sm:$0xff] %vm3162_vm0, %v1173_v20  ;;  %v1924_v34 = vpop.eup %1923  ;;  %1939 = vrcp.f32 %v1415_v24  ;;  %v1433_v54 = vmul.f32 %v1922_v36, %v1393_v11  ;;  %v1534_v3 = vsub.f32 %v1470_v50, %v1507_v37  ;;  %v1246_v56 = vpop.xlane.xlu0 %1245  ;;  %v1463_v36 = vld [vmem:[#allocation3 + $0x68] sm:$0xff] }
 0x3e8   :  { %1562 = vst.msk [vmem:[%s3055_s4] sm:$0xff] %vm3229_vm14, %v1546_v32  ;;  %v1926_v57 = vpop.eup %1925  ;;  %v1549_v0 = vmul.f32 -1.0, %v1533_v40  ;;  %v1509_v39 = vmul.f32 0.6931472, %v1924_v34  ;;  %v1266_v6 = vadd.f32 %v1246_v56, %v1202_v43  ;;  %v1474_v60 = vsub.f32 %v1435_v21, %v1458_v28  ;;  %v3244_v21 = vld [vmem:[#allocation27_spill] sm:$0xff]  ;;  %vm3246_vm14 = vmmov %vm3162_vm0 }
 0x3e9   :  { %v1550_v44 = vmul.f32 -1.0, %v1534_v3  ;;  %v1511_v47 = vmul.f32 0.6931472, %v1926_v57  ;;  %v1928_v63 = vpop.eup %1927  ;;  %v1473_v30 = vsub.f32 %v1433_v54, %v1457_v46 }
 0x3ea   :  { %v1495_v45 = vld [vmem:[#allocation4 + $0x68] sm:$0xff]  ;;  %1565 = vst.msk [vmem:[%s3055_s4 + $0x18] sm:$0xff] %vm3230_vm4, %v1549_v0  ;;  %v1535_v13 = vsub.f32 %v1471_v25, %v1509_v39  ;;  %v1437_v48 = vmul.f32 %v1928_v63, %v1395_v2  ;;  %v1492_v63 = vld [vmem:[#allocation4 + $0x50] sm:$0xff]  ;;  %vm3247_vm4 = vmmov %vm3162_vm0 }
 0x3eb   :  { %1941 = vlog2.f32 %v1495_v45  ;;  %1282 = vst.msk [vmem:[#allocation5 + $0x58] sm:$0xff] %vm3231_vm5, %v1266_v6  ;;  %v1930_v59 = vpop.eup %1929  ;;  %v1536_v31 = vsub.f32 %v1472_v42, %v1511_v47  ;;  %v1250_v26 = vpop.xlane.xlu0 %1249  ;;  %v3243_v42 = vld [vmem:[#allocation29_spill] sm:$0xff]  ;;  %v1108_v45 = vld [vmem:[#allocation4 + $0x70] sm:$0xff]  ;;  %vm3248_vm5 = vmmov %vm3162_vm0 }
 0x3ec   :  { %1943 = vrcp.f32 %v1417_v10  ;;  %1566 = vst.msk [vmem:[%s3055_s4 + $0x20] sm:$0xff] %vm3232_vm6, %v1550_v44  ;;  %v1932_v27 = vpop.eup %1931  ;;  %v1551_v49 = vmul.f32 -1.0, %v1535_v13  ;;  %v1513_v51 = vmul.f32 0.6931472, %v1930_v59  ;;  %v1268_v5 = vadd.f32 %v1250_v26, %v1204_v16  ;;  %v1412_v16 = vld [vmem:[#allocation6 + $0x50] sm:$0xff]  ;;  %v1414_v59 = vld [vmem:[#allocation6 + $0x60] sm:$0xff]  ;;  %vm3249_vm6 = vmmov %vm3162_vm0 }
 0x3ed   :  { %v1552_v22 = vmul.f32 -1.0, %v1536_v31  ;;  %v1515_v58 = vmul.f32 0.6931472, %v1932_v27  ;;  %v1475_v14 = vsub.f32 %v1437_v48, %v1459_v1  ;;  %v884_v2 = vsub.f32 %v3244_v21, %v3243_v42  ;;  %v1494_v31 = vld [vmem:[#allocation4 + $0x60] sm:$0xff]  ;;  %v1201_v26 = vld [vmem:[#allocation5 + $0x50] sm:$0xff] }
 0x3ee   :  { %v1497_v7 = vld [vmem:[#allocation4 + $0x78] sm:$0xff]  ;;  %1567 = vst.msk [vmem:[%s3055_s4 + $0x28] sm:$0xff] %vm3233_vm15, %v1551_v49  ;;  %v1537_v12 = vsub.f32 %v1473_v30, %v1513_v51  ;;  %v1416_v48 = vld [vmem:[#allocation6 + $0x70] sm:$0xff]  ;;  %v1203_v49 = vld [vmem:[#allocation5 + $0x60] sm:$0xff] }
 0x3ef   :  { %1945 = vlog2.f32 %v1497_v7  ;;  %1284 = vst.msk [vmem:[#allocation5 + $0x68] sm:$0xff] %vm3234_vm13, %v1268_v5  ;;  %v1934_v52 = vpop.eup %1933  ;;  %v1538_v9 = vsub.f32 %v1474_v60, %v1515_v58  ;;  %v1254_v53 = vpop.xlane.xlu0 %1253  ;;  %v914_v44 = vmul.f32 1.442695, %v884_v2  ;;  %vm3250_vm15 = vmmov %vm3162_vm0 }
 0x3f0   :  { %1568 = vst.msk [vmem:[%s3055_s4 + $0x30] sm:$0xff] %vm3235_vm11, %v1552_v22  ;;  %v1936_v17 = vpop.eup %1935  ;;  %v1553_v23 = vmul.f32 -1.0, %v1537_v12  ;;  %v1517_v35 = vmul.f32 0.6931472, %v1934_v52  ;;  %v1270_v55 = vadd.f32 %v1254_v53, %v1206_v61  ;;  %v1205_v22 = vld [vmem:[#allocation5 + $0x70] sm:$0xff] }
 0x3f1   :  { %v1554_v33 = vmul.f32 -1.0, %v1538_v9  ;;  %1947 = vpow2.f32 %v914_v44  ;;  %v1460_v9 = vld [vmem:[#allocation3 + $0x50] sm:$0xff] }
 0x3f2   :  { %v1397_v24 = vld [vmem:[#allocation5 + $0x58] sm:$0xff]  ;;  %1569 = vst.msk [vmem:[%s3055_s4 + $0x38] sm:$0xff] %vm3236_vm2, %v1553_v23  ;;  %v1539_v38 = vsub.f32 %v1475_v14, %v1517_v35  ;;  %1949 = vrcp.f32 %v1412_v16 }
 0x3f3   :  { %v1441_v11 = vmul.f32 %v1936_v17, %v1397_v24  ;;  %1286 = vst.msk [vmem:[#allocation5 + $0x78] sm:$0xff] %vm3237_vm10, %v1270_v55  ;;  %v1938_v8 = vpop.eup %1937  ;;  %1951 = vlog2.f32 %v1492_v63  ;;  %v1462_v24 = vld [vmem:[#allocation3 + $0x60] sm:$0xff] }
 0x3f4   :  { %1570 = vst.msk [vmem:[%s3055_s4 + $0x40] sm:$0xff] %vm3238_vm12, %v1554_v33  ;;  %v1940_v20 = vpop.eup %1939  ;;  %v1555_v4 = vmul.f32 -1.0, %v1539_v38  ;;  %v1521_v50 = vmul.f32 0.6931472, %v1938_v8  ;;  %1953 = vrcp.f32 %v1414_v59 }
 0x3f5   :  { %v1477_v19 = vsub.f32 %v1441_v11, %v1461_v62  ;;  %1955 = vlog2.f32 %v1494_v31 }
 0x3f6   :  { %v1399_v32 = vld [vmem:[#allocation5 + $0x68] sm:$0xff]  ;;  %1571 = vst.msk [vmem:[%s3055_s4 + $0x48] sm:$0xff] %vm3239_vm7, %v1555_v4  ;;  %1957 = vrcp.f32 %v1416_v48 }
 0x3f7   :  { %v1541_v37 = vsub.f32 %v1477_v19, %v1521_v50  ;;  %v1445_v29 = vmul.f32 %v1940_v20, %v1399_v32  ;;  %v1464_v32 = vld [vmem:[#allocation3 + $0x70] sm:$0xff] }
 0x3f8   :  { %v1942_v43 = vpop.eup %1941 }
 0x3f9   :  { %v1944_v15 = vpop.eup %1943  ;;  %v1525_v40 = vmul.f32 0.6931472, %v1942_v43  ;;  %v1557_v34 = vmul.f32 -1.0, %v1541_v37  ;;  %v1479_v41 = vsub.f32 %v1445_v29, %v1463_v36 }
 0x3fa   :  { %v1401_v54 = vld [vmem:[#allocation5 + $0x78] sm:$0xff] }
 0x3fb   :  { %1573 = vst.msk [vmem:[%s3055_s4 + $0x58] sm:$0xff] %vm3240_vm1, %v1557_v34  ;;  %v1543_v3 = vsub.f32 %v1479_v41, %v1525_v40  ;;  %v1449_v56 = vmul.f32 %v1944_v15, %v1401_v54 }
 0x3fc   :  { %v1946_v57 = vpop.eup %1945 }
 0x3fd   :  { %v1529_v25 = vmul.f32 0.6931472, %v1946_v57  ;;  %v1559_v10 = vmul.f32 -1.0, %v1543_v3  ;;  %v1481_v0 = vsub.f32 %v1449_v56, %v1465_v18 }
 0x3fe   :  { %v1948_v47 = vpop.eup %1947 }
 0x3ff   :  { %1575 = vst.msk [vmem:[%s3055_s4 + $0x68] sm:$0xff] %vm3241_vm8, %v1559_v10  ;;  %v1545_v39 = vsub.f32 %v1481_v0, %v1529_v25  ;;  %v1124_v46 = vmul.f32 %v1948_v47, %v1108_v45  ;;  %v1950_v7 = vpop.eup %1949 }
 0x400   :  { %v1952_v12 = vpop.eup %1951 }
 0x401   :  { %v1561_v6 = vmul.f32 -1.0, %v1545_v39  ;;  %v1954_v53 = vpop.eup %1953  ;;  %v1519_v17 = vmul.f32 0.6931472, %v1952_v12 }
 0x402   :  { %v1956_v23 = vpop.eup %1955 }
 0x403   :  { %1577 = vst.msk [vmem:[%s3055_s4 + $0x78] sm:$0xff] %vm3242_vm3, %v1561_v6  ;;  %v1523_v38 = vmul.f32 0.6931472, %v1956_v23  ;;  %v1958_v62 = vpop.eup %1957 }
 0x42c   :  { %v1155_v13 = vpop.xlane.xlu1 %1154 }
 0x42d   :  { %v1172_v30 = vadd.f32 %v1155_v13, %v1124_v46 }
 0x42f   :  { %1189 = vst.msk [vmem:[#allocation4 + $0x70] sm:$0xff] %vm3245_vm9, %v1172_v30 }
 0x430   :  { %v1244_v27 = vpop.xlane.xlu1 %1243 }
 0x431   :  { %v1265_v28 = vadd.f32 %v1244_v27, %v1201_v26 }
 0x433   :  { %1281 = vst.msk [vmem:[#allocation5 + $0x50] sm:$0xff] %vm3162_vm0, %v1265_v28 }
 0x434   :  { %v1248_v51 = vpop.xlane.xlu1 %1247 }
 0x435   :  { %v1267_v5 = vadd.f32 %v1248_v51, %v1203_v49 }
 0x436   :  { %v1496_v60 = vld [vmem:[#allocation4 + $0x70] sm:$0xff] }
 0x437   :  { %1959 = vlog2.f32 %v1496_v60  ;;  %1283 = vst.msk [vmem:[#allocation5 + $0x60] sm:$0xff] %vm3246_vm14, %v1267_v5 }
 0x438   :  { %v1252_v58 = vpop.xlane.xlu1 %1251 }
 0x439   :  { %v1269_v61 = vadd.f32 %v1252_v58, %v1205_v22 }
 0x43a   :  { %v1396_v52 = vld [vmem:[#allocation5 + $0x50] sm:$0xff] }
 0x43b   :  { %v1439_v1 = vmul.f32 %v1950_v7, %v1396_v52  ;;  %1285 = vst.msk [vmem:[#allocation5 + $0x70] sm:$0xff] %vm3247_vm4, %v1269_v61 }
 0x43d   :  { %v1476_v14 = vsub.f32 %v1439_v1, %v1460_v9 }
 0x43e   :  { %v1398_v35 = vld [vmem:[#allocation5 + $0x60] sm:$0xff] }
 0x43f   :  { %v1540_v55 = vsub.f32 %v1476_v14, %v1519_v17  ;;  %v1443_v33 = vmul.f32 %v1954_v53, %v1398_v35 }
 0x441   :  { %v1556_v11 = vmul.f32 -1.0, %v1540_v55  ;;  %v1478_v8 = vsub.f32 %v1443_v33, %v1462_v24 }
 0x442   :  { %v1400_v20 = vld [vmem:[#allocation5 + $0x70] sm:$0xff] }
 0x443   :  { %1572 = vst.msk [vmem:[%s3055_s4 + $0x50] sm:$0xff] %vm3248_vm5, %v1556_v11  ;;  %v1542_v4 = vsub.f32 %v1478_v8, %v1523_v38  ;;  %v1447_v50 = vmul.f32 %v1958_v62, %v1400_v20 }
 0x444   :  { %v1960_v19 = vpop.eup %1959 }
 0x445   :  { %v1527_v37 = vmul.f32 0.6931472, %v1960_v19  ;;  %v1558_v29 = vmul.f32 -1.0, %v1542_v4  ;;  %v1480_v43 = vsub.f32 %v1447_v50, %v1464_v32 }
 0x447   :  { %1574 = vst.msk [vmem:[%s3055_s4 + $0x60] sm:$0xff] %vm3249_vm6, %v1558_v29  ;;  %v1544_v36 = vsub.f32 %v1480_v43, %v1527_v37 }
 0x449   :  { %v1560_v15 = vmul.f32 -1.0, %v1544_v36 }
 0x44b   :  { %1576 = vst.msk [vmem:[%s3055_s4 + $0x70] sm:$0xff] %vm3250_vm15, %v1560_v15 }
 0x44c   :  { %1582 = vsyncpa [#allocation8], 1 }

</bundles_post_ra>
